<compile_context>
chip_gen: v5e
topology: v5e:2x2
jax: 0.10.0
libtpu: 0.0.40
codegen_flags: <defaults>
</compile_context>

<pallas_src>
import jax
import jax.numpy as jnp
from jax.experimental import pallas as pl
from jax.experimental.pallas import tpu as pltpu


def lstm_classifier_kernel(x_ref, wih_ref, whh_ref, b_ref, fcw_ref, fcb_ref,
                           out_ref):
    """Single program: whole sequence + all weights resident in VMEM.

    Phase 1: one big MXU matmul for the input projection of ALL time steps.
    Phase 2: fully unrolled time recurrence (only h @ W_hh^T per step).
    Phase 3: lane-dense (padded to 128) classifier matmul on h_T.
    """
    H = whh_ref.shape[0]
    TB = x_ref.shape[0]
    B = out_ref.shape[0]
    T = TB // B

    # ---- Phase 1: hoisted input projection; bias broadcast exactly once.
    # (T*B, D_pad) bf16 @ (D_pad, 4H) bf16 -> (T*B, 4H) f32
    gx = jnp.dot(x_ref[...], wih_ref[...],
                 preferred_element_type=jnp.float32) + b_ref[...]

    whh = whh_ref[...]                       # (H, 4H) bf16, loaded once

    h = jnp.zeros((B, H), jnp.float32)
    c = jnp.zeros((B, H), jnp.float32)

    # ---- Phase 2: time recurrence.  T is a small static int, so the Python
    # loop fully unrolls at trace time (equivalent to fori_loop(unroll=True));
    # per-step state (h, c, gates) is only a handful of vregs.  All gate slices
    # below are lane-aligned (multiples of H=128) and sublane-aligned (B=8 rows).
    for t in range(T):
        gates = gx[t * B:(t + 1) * B, :] + jnp.dot(
            h.astype(whh.dtype), whh, preferred_element_type=jnp.float32)
        # PyTorch gate order [i, f, g, o]; activations kept in f32 (EUP path).
        if_g = jax.nn.sigmoid(gates[:, 0 * H:2 * H])   # i and f in one EUP pass
        i_g = if_g[:, 0 * H:1 * H]
        f_g = if_g[:, 1 * H:2 * H]
        g_g = jnp.tanh(gates[:, 2 * H:3 * H])
        o_g = jax.nn.sigmoid(gates[:, 3 * H:4 * H])
        c = f_g * c + i_g * g_g
        h = o_g * jnp.tanh(c)

    # ---- Phase 3: classifier on the last hidden state (padded, lane-dense).
    logits = jnp.dot(h.astype(fcw_ref.dtype), fcw_ref[...],
                     preferred_element_type=jnp.float32) + fcb_ref[...]
    out_ref[...] = logits.astype(out_ref.dtype)


@jax.jit
def lstm_classifier_forward(x, w_ih, w_hh, b_ih, b_hh, fc_w, fc_b):
    """x: (T, B, input_size). PyTorch-shaped params:
       w_ih (4H, in), w_hh (4H, H), b_ih (4H,), b_hh (4H,), fc_w (C, H), fc_b (C,)."""
    T, B, D = x.shape
    H = w_hh.shape[1]
    C = fc_w.shape[0]
    C_pad = max(128, ((C + 127) // 128) * 128)   # lane-dense classifier width
    D_pad = max(128, ((D + 127) // 128) * 128)   # lane-dense / sublane-aligned feature width

    # Glue (plain JAX): flatten time into the matmul M dim, zero-pad the feature
    # dim, pre-transpose weights for row-major MXU matmuls, cast matmul operands
    # to bf16, pad the classifier weights / bias / output to 128 lanes.
    x2d = jnp.zeros((T * B, D_pad), jnp.bfloat16).at[:, :D].set(
        x.reshape(T * B, D).astype(jnp.bfloat16))                 # (T*B, D_pad)
    wih_t = jnp.zeros((D_pad, 4 * H), jnp.bfloat16).at[:D, :].set(
        jnp.transpose(w_ih).astype(jnp.bfloat16))                 # (D_pad, 4H)
    whh_t = jnp.transpose(w_hh).astype(jnp.bfloat16)              # (H, 4H)
    bias = (b_ih + b_hh).reshape(1, 4 * H).astype(jnp.float32)    # (1, 4H)
    fcw_t = jnp.zeros((H, C_pad), jnp.bfloat16).at[:, :C].set(
        jnp.transpose(fc_w).astype(jnp.bfloat16))                 # (H, C_pad)
    fcb = jnp.zeros((1, C_pad), jnp.float32).at[:, :C].set(
        fc_b.astype(jnp.float32))                                 # (1, C_pad)

    out_padded = pl.pallas_call(
        lstm_classifier_kernel,
        out_shape=jax.ShapeDtypeStruct((B, C_pad), jnp.float32),
        grid_spec=pltpu.PrefetchScalarGridSpec(
            num_scalar_prefetch=0,
            grid=(1,),                       # single program; recurrence in-kernel
            in_specs=[
                pl.BlockSpec((T * B, D_pad), lambda i: (0, 0)),   # x (flattened, padded)
                pl.BlockSpec((D_pad, 4 * H), lambda i: (0, 0)),   # W_ih^T (padded)
                pl.BlockSpec((H, 4 * H), lambda i: (0, 0)),       # W_hh^T
                pl.BlockSpec((1, 4 * H), lambda i: (0, 0)),       # b_ih + b_hh
                pl.BlockSpec((H, C_pad), lambda i: (0, 0)),       # fc W^T (padded)
                pl.BlockSpec((1, C_pad), lambda i: (0, 0)),       # fc b (padded)
            ],
            out_specs=pl.BlockSpec((B, C_pad), lambda i: (0, 0)),
        ),
        compiler_params=pltpu.CompilerParams(
            dimension_semantics=("arbitrary",),
        ),
    )(x2d, wih_t, whh_t, bias, fcw_t, fcb)

    # TODO(synk): for large batch, add a 'parallel' batch-tile grid axis so
    # megacore / the 2nd v7x TensorCore can be used; pointless at B=8.
    return out_padded[:, :C]


def lstm_classifier_ref(x, w_ih, w_hh, b_ih, b_hh, fc_w, fc_b):
    """Pure-JAX f32 reference matching PyTorch nn.LSTM + nn.Linear semantics."""
    T, B, D = x.shape
    H = w_hh.shape[1]

    def step(carry, x_t):
        h, c = carry
        gates = x_t @ w_ih.T + b_ih + h @ w_hh.T + b_hh
        i = jax.nn.sigmoid(gates[:, 0 * H:1 * H])
        f = jax.nn.sigmoid(gates[:, 1 * H:2 * H])
        g = jnp.tanh(gates[:, 2 * H:3 * H])
        o = jax.nn.sigmoid(gates[:, 3 * H:4 * H])
        c = f * c + i * g
        h = o * jnp.tanh(c)
        return (h, c), h

    h0 = jnp.zeros((B, H), jnp.float32)
    c0 = jnp.zeros((B, H), jnp.float32)
    (h_T, _), _ = jax.lax.scan(step, (h0, c0), x.astype(jnp.float32))
    return h_T @ fc_w.T + fc_b


if __name__ == "__main__":
    classes, input_size, hidden_size = 10, 28, 128
    seq_len, batch = 8, 8

    key = jax.random.PRNGKey(0)
    ks = jax.random.split(key, 7)
    bound = 1.0 / jnp.sqrt(hidden_size)

    # Deterministic synthetic parameters (PyTorch-style uniform init shapes).
    w_ih = jax.random.uniform(ks[0], (4 * hidden_size, input_size), jnp.float32, -bound, bound)
    w_hh = jax.random.uniform(ks[1], (4 * hidden_size, hidden_size), jnp.float32, -bound, bound)
    b_ih = jax.random.uniform(ks[2], (4 * hidden_size,), jnp.float32, -bound, bound)
    b_hh = jax.random.uniform(ks[3], (4 * hidden_size,), jnp.float32, -bound, bound)
    fc_w = jax.random.uniform(ks[4], (classes, hidden_size), jnp.float32, -bound, bound)
    fc_b = jax.random.uniform(ks[5], (classes,), jnp.float32, -bound, bound)

    x = jax.random.normal(ks[6], (seq_len, batch, input_size), jnp.float32)

    out = lstm_classifier_forward(x, w_ih, w_hh, b_ih, b_hh, fc_w, fc_b)
    out = jax.block_until_ready(out)

    ref = lstm_classifier_ref(x, w_ih, w_hh, b_ih, b_hh, fc_w, fc_b)
    assert out.shape == (batch, classes)
    # Looser tolerance than a pure-f32 kernel: matmul operands are bf16
    # (f32 accumulation), so compare against the f32 reference at ~1e-2 level.
    max_err = jnp.max(jnp.abs(out - ref))
    assert max_err < 2e-2, f"max abs err {max_err}"

    print("KERNEL_OK")
</pallas_src>

<mosaic_0001>
module attributes {stable_mosaic.version = 11 : i64} {
  func.func @lstm_classifier_kernel(%arg0: i32, %arg1: memref<64x128xbf16, #tpu.memory_space<vmem>>, %arg2: memref<128x512xbf16, #tpu.memory_space<vmem>>, %arg3: memref<128x512xbf16, #tpu.memory_space<vmem>>, %arg4: memref<1x512xf32, #tpu.memory_space<vmem>>, %arg5: memref<128x128xbf16, #tpu.memory_space<vmem>>, %arg6: memref<1x128xf32, #tpu.memory_space<vmem>>, %arg7: memref<8x128xf32, #tpu.memory_space<vmem>>) attributes {dimension_semantics = [#tpu.dimension_semantics<arbitrary>], iteration_bounds = array<i64: 1>, scalar_prefetch = 0 : i64, scratch_operands = 0 : i64, tpu.core_type = #tpu.core_type<tc>, window_params = [{pipeline_mode = #tpu.pipeline_mode<synchronous>, transform_indices = @transform_0, window_bounds = array<i64: 64, 128>}, {pipeline_mode = #tpu.pipeline_mode<synchronous>, transform_indices = @transform_1, window_bounds = array<i64: 128, 512>}, {pipeline_mode = #tpu.pipeline_mode<synchronous>, transform_indices = @transform_2, window_bounds = array<i64: 128, 512>}, {pipeline_mode = #tpu.pipeline_mode<synchronous>, transform_indices = @transform_3, window_bounds = array<i64: 1, 512>}, {pipeline_mode = #tpu.pipeline_mode<synchronous>, transform_indices = @transform_4, window_bounds = array<i64: 128, 128>}, {pipeline_mode = #tpu.pipeline_mode<synchronous>, transform_indices = @transform_5, window_bounds = array<i64: 1, 128>}, {pipeline_mode = #tpu.pipeline_mode<synchronous>, transform_indices = @transform_6, window_bounds = array<i64: 8, 128>}]} {
    %c0 = arith.constant 0 : index
    %c0_0 = arith.constant 0 : index
    %0 = vector.load %arg1[%c0, %c0_0] : memref<64x128xbf16, #tpu.memory_space<vmem>>, vector<64x128xbf16>
    %c0_1 = arith.constant 0 : index
    %c0_2 = arith.constant 0 : index
    %1 = vector.load %arg2[%c0_1, %c0_2] : memref<128x512xbf16, #tpu.memory_space<vmem>>, vector<128x512xbf16>
    %cst = arith.constant dense<0.000000e+00> : vector<64x512xf32>
    %2 = tpu.matmul %0, %1, %cst {dimension_numbers = #tpu.dot_dimension_numbers<[1], [0], [0], [1], [0, 0, 1, 1], [], []>} : vector<64x128xbf16>, vector<128x512xbf16>, vector<64x512xf32> -> vector<64x512xf32>
    %c0_3 = arith.constant 0 : index
    %c0_4 = arith.constant 0 : index
    %3 = vector.load %arg4[%c0_3, %c0_4] : memref<1x512xf32, #tpu.memory_space<vmem>>, vector<1x512xf32>
    %4 = vector.broadcast %3 : vector<1x512xf32> to vector<64x512xf32>
    %5 = arith.addf %2, %4 : vector<64x512xf32>
    %c0_5 = arith.constant 0 : index
    %c0_6 = arith.constant 0 : index
    %6 = vector.load %arg3[%c0_5, %c0_6] : memref<128x512xbf16, #tpu.memory_space<vmem>>, vector<128x512xbf16>
    %cst_7 = arith.constant 0.000000e+00 : f32
    %7 = vector.broadcast %cst_7 : f32 to vector<8x128xf32>
    %cst_8 = arith.constant 0.000000e+00 : f32
    %8 = vector.broadcast %cst_8 : f32 to vector<8x128xf32>
    %9 = vector.extract_strided_slice %5 {offsets = [0, 0], sizes = [8, 512], strides = [1, 1]} : vector<64x512xf32> to vector<8x512xf32>
    %10 = arith.truncf %7 : vector<8x128xf32> to vector<8x128xbf16>
    %cst_9 = arith.constant dense<0.000000e+00> : vector<8x512xf32>
    %11 = tpu.matmul %10, %6, %cst_9 {dimension_numbers = #tpu.dot_dimension_numbers<[1], [0], [0], [1], [0, 0, 1, 1], [], []>} : vector<8x128xbf16>, vector<128x512xbf16>, vector<8x512xf32> -> vector<8x512xf32>
    %12 = arith.addf %9, %11 : vector<8x512xf32>
    %13 = vector.extract_strided_slice %12 {offsets = [0, 0], sizes = [8, 256], strides = [1, 1]} : vector<8x512xf32> to vector<8x256xf32>
    %14 = arith.negf %13 : vector<8x256xf32>
    %15 = math.exp %14 : vector<8x256xf32>
    %cst_10 = arith.constant 1.000000e+00 : f32
    %16 = vector.broadcast %cst_10 : f32 to vector<8x256xf32>
    %17 = arith.addf %16, %15 : vector<8x256xf32>
    %18 = arith.divf %16, %17 : vector<8x256xf32>
    %19 = vector.extract_strided_slice %18 {offsets = [0, 0], sizes = [8, 128], strides = [1, 1]} : vector<8x256xf32> to vector<8x128xf32>
    %20 = vector.extract_strided_slice %18 {offsets = [0, 128], sizes = [8, 128], strides = [1, 1]} : vector<8x256xf32> to vector<8x128xf32>
    %21 = vector.extract_strided_slice %12 {offsets = [0, 256], sizes = [8, 128], strides = [1, 1]} : vector<8x512xf32> to vector<8x128xf32>
    %22 = math.tanh %21 : vector<8x128xf32>
    %23 = vector.extract_strided_slice %12 {offsets = [0, 384], sizes = [8, 128], strides = [1, 1]} : vector<8x512xf32> to vector<8x128xf32>
    %24 = arith.negf %23 : vector<8x128xf32>
    %25 = math.exp %24 : vector<8x128xf32>
    %cst_11 = arith.constant 1.000000e+00 : f32
    %26 = vector.broadcast %cst_11 : f32 to vector<8x128xf32>
    %27 = arith.addf %26, %25 : vector<8x128xf32>
    %28 = arith.divf %26, %27 : vector<8x128xf32>
    %29 = arith.mulf %20, %8 : vector<8x128xf32>
    %30 = arith.mulf %19, %22 : vector<8x128xf32>
    %31 = arith.addf %29, %30 : vector<8x128xf32>
    %32 = math.tanh %31 : vector<8x128xf32>
    %33 = arith.mulf %28, %32 : vector<8x128xf32>
    %34 = vector.extract_strided_slice %5 {offsets = [8, 0], sizes = [8, 512], strides = [1, 1]} : vector<64x512xf32> to vector<8x512xf32>
    %35 = arith.truncf %33 : vector<8x128xf32> to vector<8x128xbf16>
    %cst_12 = arith.constant dense<0.000000e+00> : vector<8x512xf32>
    %36 = tpu.matmul %35, %6, %cst_12 {dimension_numbers = #tpu.dot_dimension_numbers<[1], [0], [0], [1], [0, 0, 1, 1], [], []>} : vector<8x128xbf16>, vector<128x512xbf16>, vector<8x512xf32> -> vector<8x512xf32>
    %37 = arith.addf %34, %36 : vector<8x512xf32>
    %38 = vector.extract_strided_slice %37 {offsets = [0, 0], sizes = [8, 256], strides = [1, 1]} : vector<8x512xf32> to vector<8x256xf32>
    %39 = arith.negf %38 : vector<8x256xf32>
    %40 = math.exp %39 : vector<8x256xf32>
    %cst_13 = arith.constant 1.000000e+00 : f32
    %41 = vector.broadcast %cst_13 : f32 to vector<8x256xf32>
    %42 = arith.addf %41, %40 : vector<8x256xf32>
    %43 = arith.divf %41, %42 : vector<8x256xf32>
    %44 = vector.extract_strided_slice %43 {offsets = [0, 0], sizes = [8, 128], strides = [1, 1]} : vector<8x256xf32> to vector<8x128xf32>
    %45 = vector.extract_strided_slice %43 {offsets = [0, 128], sizes = [8, 128], strides = [1, 1]} : vector<8x256xf32> to vector<8x128xf32>
    %46 = vector.extract_strided_slice %37 {offsets = [0, 256], sizes = [8, 128], strides = [1, 1]} : vector<8x512xf32> to vector<8x128xf32>
    %47 = math.tanh %46 : vector<8x128xf32>
    %48 = vector.extract_strided_slice %37 {offsets = [0, 384], sizes = [8, 128], strides = [1, 1]} : vector<8x512xf32> to vector<8x128xf32>
    %49 = arith.negf %48 : vector<8x128xf32>
    %50 = math.exp %49 : vector<8x128xf32>
    %cst_14 = arith.constant 1.000000e+00 : f32
    %51 = vector.broadcast %cst_14 : f32 to vector<8x128xf32>
    %52 = arith.addf %51, %50 : vector<8x128xf32>
    %53 = arith.divf %51, %52 : vector<8x128xf32>
    %54 = arith.mulf %45, %31 : vector<8x128xf32>
    %55 = arith.mulf %44, %47 : vector<8x128xf32>
    %56 = arith.addf %54, %55 : vector<8x128xf32>
    %57 = math.tanh %56 : vector<8x128xf32>
    %58 = arith.mulf %53, %57 : vector<8x128xf32>
    %59 = vector.extract_strided_slice %5 {offsets = [16, 0], sizes = [8, 512], strides = [1, 1]} : vector<64x512xf32> to vector<8x512xf32>
    %60 = arith.truncf %58 : vector<8x128xf32> to vector<8x128xbf16>
    %cst_15 = arith.constant dense<0.000000e+00> : vector<8x512xf32>
    %61 = tpu.matmul %60, %6, %cst_15 {dimension_numbers = #tpu.dot_dimension_numbers<[1], [0], [0], [1], [0, 0, 1, 1], [], []>} : vector<8x128xbf16>, vector<128x512xbf16>, vector<8x512xf32> -> vector<8x512xf32>
    %62 = arith.addf %59, %61 : vector<8x512xf32>
    %63 = vector.extract_strided_slice %62 {offsets = [0, 0], sizes = [8, 256], strides = [1, 1]} : vector<8x512xf32> to vector<8x256xf32>
    %64 = arith.negf %63 : vector<8x256xf32>
    %65 = math.exp %64 : vector<8x256xf32>
    %cst_16 = arith.constant 1.000000e+00 : f32
    %66 = vector.broadcast %cst_16 : f32 to vector<8x256xf32>
    %67 = arith.addf %66, %65 : vector<8x256xf32>
    %68 = arith.divf %66, %67 : vector<8x256xf32>
    %69 = vector.extract_strided_slice %68 {offsets = [0, 0], sizes = [8, 128], strides = [1, 1]} : vector<8x256xf32> to vector<8x128xf32>
    %70 = vector.extract_strided_slice %68 {offsets = [0, 128], sizes = [8, 128], strides = [1, 1]} : vector<8x256xf32> to vector<8x128xf32>
    %71 = vector.extract_strided_slice %62 {offsets = [0, 256], sizes = [8, 128], strides = [1, 1]} : vector<8x512xf32> to vector<8x128xf32>
    %72 = math.tanh %71 : vector<8x128xf32>
    %73 = vector.extract_strided_slice %62 {offsets = [0, 384], sizes = [8, 128], strides = [1, 1]} : vector<8x512xf32> to vector<8x128xf32>
    %74 = arith.negf %73 : vector<8x128xf32>
    %75 = math.exp %74 : vector<8x128xf32>
    %cst_17 = arith.constant 1.000000e+00 : f32
    %76 = vector.broadcast %cst_17 : f32 to vector<8x128xf32>
    %77 = arith.addf %76, %75 : vector<8x128xf32>
    %78 = arith.divf %76, %77 : vector<8x128xf32>
    %79 = arith.mulf %70, %56 : vector<8x128xf32>
    %80 = arith.mulf %69, %72 : vector<8x128xf32>
    %81 = arith.addf %79, %80 : vector<8x128xf32>
    %82 = math.tanh %81 : vector<8x128xf32>
    %83 = arith.mulf %78, %82 : vector<8x128xf32>
    %84 = vector.extract_strided_slice %5 {offsets = [24, 0], sizes = [8, 512], strides = [1, 1]} : vector<64x512xf32> to vector<8x512xf32>
    %85 = arith.truncf %83 : vector<8x128xf32> to vector<8x128xbf16>
    %cst_18 = arith.constant dense<0.000000e+00> : vector<8x512xf32>
    %86 = tpu.matmul %85, %6, %cst_18 {dimension_numbers = #tpu.dot_dimension_numbers<[1], [0], [0], [1], [0, 0, 1, 1], [], []>} : vector<8x128xbf16>, vector<128x512xbf16>, vector<8x512xf32> -> vector<8x512xf32>
    %87 = arith.addf %84, %86 : vector<8x512xf32>
    %88 = vector.extract_strided_slice %87 {offsets = [0, 0], sizes = [8, 256], strides = [1, 1]} : vector<8x512xf32> to vector<8x256xf32>
    %89 = arith.negf %88 : vector<8x256xf32>
    %90 = math.exp %89 : vector<8x256xf32>
    %cst_19 = arith.constant 1.000000e+00 : f32
    %91 = vector.broadcast %cst_19 : f32 to vector<8x256xf32>
    %92 = arith.addf %91, %90 : vector<8x256xf32>
    %93 = arith.divf %91, %92 : vector<8x256xf32>
    %94 = vector.extract_strided_slice %93 {offsets = [0, 0], sizes = [8, 128], strides = [1, 1]} : vector<8x256xf32> to vector<8x128xf32>
    %95 = vector.extract_strided_slice %93 {offsets = [0, 128], sizes = [8, 128], strides = [1, 1]} : vector<8x256xf32> to vector<8x128xf32>
    %96 = vector.extract_strided_slice %87 {offsets = [0, 256], sizes = [8, 128], strides = [1, 1]} : vector<8x512xf32> to vector<8x128xf32>
    %97 = math.tanh %96 : vector<8x128xf32>
    %98 = vector.extract_strided_slice %87 {offsets = [0, 384], sizes = [8, 128], strides = [1, 1]} : vector<8x512xf32> to vector<8x128xf32>
    %99 = arith.negf %98 : vector<8x128xf32>
    %100 = math.exp %99 : vector<8x128xf32>
    %cst_20 = arith.constant 1.000000e+00 : f32
    %101 = vector.broadcast %cst_20 : f32 to vector<8x128xf32>
    %102 = arith.addf %101, %100 : vector<8x128xf32>
    %103 = arith.divf %101, %102 : vector<8x128xf32>
    %104 = arith.mulf %95, %81 : vector<8x128xf32>
    %105 = arith.mulf %94, %97 : vector<8x128xf32>
    %106 = arith.addf %104, %105 : vector<8x128xf32>
    %107 = math.tanh %106 : vector<8x128xf32>
    %108 = arith.mulf %103, %107 : vector<8x128xf32>
    %109 = vector.extract_strided_slice %5 {offsets = [32, 0], sizes = [8, 512], strides = [1, 1]} : vector<64x512xf32> to vector<8x512xf32>
    %110 = arith.truncf %108 : vector<8x128xf32> to vector<8x128xbf16>
    %cst_21 = arith.constant dense<0.000000e+00> : vector<8x512xf32>
    %111 = tpu.matmul %110, %6, %cst_21 {dimension_numbers = #tpu.dot_dimension_numbers<[1], [0], [0], [1], [0, 0, 1, 1], [], []>} : vector<8x128xbf16>, vector<128x512xbf16>, vector<8x512xf32> -> vector<8x512xf32>
    %112 = arith.addf %109, %111 : vector<8x512xf32>
    %113 = vector.extract_strided_slice %112 {offsets = [0, 0], sizes = [8, 256], strides = [1, 1]} : vector<8x512xf32> to vector<8x256xf32>
    %114 = arith.negf %113 : vector<8x256xf32>
    %115 = math.exp %114 : vector<8x256xf32>
    %cst_22 = arith.constant 1.000000e+00 : f32
    %116 = vector.broadcast %cst_22 : f32 to vector<8x256xf32>
    %117 = arith.addf %116, %115 : vector<8x256xf32>
    %118 = arith.divf %116, %117 : vector<8x256xf32>
    %119 = vector.extract_strided_slice %118 {offsets = [0, 0], sizes = [8, 128], strides = [1, 1]} : vector<8x256xf32> to vector<8x128xf32>
    %120 = vector.extract_strided_slice %118 {offsets = [0, 128], sizes = [8, 128], strides = [1, 1]} : vector<8x256xf32> to vector<8x128xf32>
    %121 = vector.extract_strided_slice %112 {offsets = [0, 256], sizes = [8, 128], strides = [1, 1]} : vector<8x512xf32> to vector<8x128xf32>
    %122 = math.tanh %121 : vector<8x128xf32>
    %123 = vector.extract_strided_slice %112 {offsets = [0, 384], sizes = [8, 128], strides = [1, 1]} : vector<8x512xf32> to vector<8x128xf32>
    %124 = arith.negf %123 : vector<8x128xf32>
    %125 = math.exp %124 : vector<8x128xf32>
    %cst_23 = arith.constant 1.000000e+00 : f32
    %126 = vector.broadcast %cst_23 : f32 to vector<8x128xf32>
    %127 = arith.addf %126, %125 : vector<8x128xf32>
    %128 = arith.divf %126, %127 : vector<8x128xf32>
    %129 = arith.mulf %120, %106 : vector<8x128xf32>
    %130 = arith.mulf %119, %122 : vector<8x128xf32>
    %131 = arith.addf %129, %130 : vector<8x128xf32>
    %132 = math.tanh %131 : vector<8x128xf32>
    %133 = arith.mulf %128, %132 : vector<8x128xf32>
    %134 = vector.extract_strided_slice %5 {offsets = [40, 0], sizes = [8, 512], strides = [1, 1]} : vector<64x512xf32> to vector<8x512xf32>
    %135 = arith.truncf %133 : vector<8x128xf32> to vector<8x128xbf16>
    %cst_24 = arith.constant dense<0.000000e+00> : vector<8x512xf32>
    %136 = tpu.matmul %135, %6, %cst_24 {dimension_numbers = #tpu.dot_dimension_numbers<[1], [0], [0], [1], [0, 0, 1, 1], [], []>} : vector<8x128xbf16>, vector<128x512xbf16>, vector<8x512xf32> -> vector<8x512xf32>
    %137 = arith.addf %134, %136 : vector<8x512xf32>
    %138 = vector.extract_strided_slice %137 {offsets = [0, 0], sizes = [8, 256], strides = [1, 1]} : vector<8x512xf32> to vector<8x256xf32>
    %139 = arith.negf %138 : vector<8x256xf32>
    %140 = math.exp %139 : vector<8x256xf32>
    %cst_25 = arith.constant 1.000000e+00 : f32
    %141 = vector.broadcast %cst_25 : f32 to vector<8x256xf32>
    %142 = arith.addf %141, %140 : vector<8x256xf32>
    %143 = arith.divf %141, %142 : vector<8x256xf32>
    %144 = vector.extract_strided_slice %143 {offsets = [0, 0], sizes = [8, 128], strides = [1, 1]} : vector<8x256xf32> to vector<8x128xf32>
    %145 = vector.extract_strided_slice %143 {offsets = [0, 128], sizes = [8, 128], strides = [1, 1]} : vector<8x256xf32> to vector<8x128xf32>
    %146 = vector.extract_strided_slice %137 {offsets = [0, 256], sizes = [8, 128], strides = [1, 1]} : vector<8x512xf32> to vector<8x128xf32>
    %147 = math.tanh %146 : vector<8x128xf32>
    %148 = vector.extract_strided_slice %137 {offsets = [0, 384], sizes = [8, 128], strides = [1, 1]} : vector<8x512xf32> to vector<8x128xf32>
    %149 = arith.negf %148 : vector<8x128xf32>
    %150 = math.exp %149 : vector<8x128xf32>
    %cst_26 = arith.constant 1.000000e+00 : f32
    %151 = vector.broadcast %cst_26 : f32 to vector<8x128xf32>
    %152 = arith.addf %151, %150 : vector<8x128xf32>
    %153 = arith.divf %151, %152 : vector<8x128xf32>
    %154 = arith.mulf %145, %131 : vector<8x128xf32>
    %155 = arith.mulf %144, %147 : vector<8x128xf32>
    %156 = arith.addf %154, %155 : vector<8x128xf32>
    %157 = math.tanh %156 : vector<8x128xf32>
    %158 = arith.mulf %153, %157 : vector<8x128xf32>
    %159 = vector.extract_strided_slice %5 {offsets = [48, 0], sizes = [8, 512], strides = [1, 1]} : vector<64x512xf32> to vector<8x512xf32>
    %160 = arith.truncf %158 : vector<8x128xf32> to vector<8x128xbf16>
    %cst_27 = arith.constant dense<0.000000e+00> : vector<8x512xf32>
    %161 = tpu.matmul %160, %6, %cst_27 {dimension_numbers = #tpu.dot_dimension_numbers<[1], [0], [0], [1], [0, 0, 1, 1], [], []>} : vector<8x128xbf16>, vector<128x512xbf16>, vector<8x512xf32> -> vector<8x512xf32>
    %162 = arith.addf %159, %161 : vector<8x512xf32>
    %163 = vector.extract_strided_slice %162 {offsets = [0, 0], sizes = [8, 256], strides = [1, 1]} : vector<8x512xf32> to vector<8x256xf32>
    %164 = arith.negf %163 : vector<8x256xf32>
    %165 = math.exp %164 : vector<8x256xf32>
    %cst_28 = arith.constant 1.000000e+00 : f32
    %166 = vector.broadcast %cst_28 : f32 to vector<8x256xf32>
    %167 = arith.addf %166, %165 : vector<8x256xf32>
    %168 = arith.divf %166, %167 : vector<8x256xf32>
    %169 = vector.extract_strided_slice %168 {offsets = [0, 0], sizes = [8, 128], strides = [1, 1]} : vector<8x256xf32> to vector<8x128xf32>
    %170 = vector.extract_strided_slice %168 {offsets = [0, 128], sizes = [8, 128], strides = [1, 1]} : vector<8x256xf32> to vector<8x128xf32>
    %171 = vector.extract_strided_slice %162 {offsets = [0, 256], sizes = [8, 128], strides = [1, 1]} : vector<8x512xf32> to vector<8x128xf32>
    %172 = math.tanh %171 : vector<8x128xf32>
    %173 = vector.extract_strided_slice %162 {offsets = [0, 384], sizes = [8, 128], strides = [1, 1]} : vector<8x512xf32> to vector<8x128xf32>
    %174 = arith.negf %173 : vector<8x128xf32>
    %175 = math.exp %174 : vector<8x128xf32>
    %cst_29 = arith.constant 1.000000e+00 : f32
    %176 = vector.broadcast %cst_29 : f32 to vector<8x128xf32>
    %177 = arith.addf %176, %175 : vector<8x128xf32>
    %178 = arith.divf %176, %177 : vector<8x128xf32>
    %179 = arith.mulf %170, %156 : vector<8x128xf32>
    %180 = arith.mulf %169, %172 : vector<8x128xf32>
    %181 = arith.addf %179, %180 : vector<8x128xf32>
    %182 = math.tanh %181 : vector<8x128xf32>
    %183 = arith.mulf %178, %182 : vector<8x128xf32>
    %184 = vector.extract_strided_slice %5 {offsets = [56, 0], sizes = [8, 512], strides = [1, 1]} : vector<64x512xf32> to vector<8x512xf32>
    %185 = arith.truncf %183 : vector<8x128xf32> to vector<8x128xbf16>
    %cst_30 = arith.constant dense<0.000000e+00> : vector<8x512xf32>
    %186 = tpu.matmul %185, %6, %cst_30 {dimension_numbers = #tpu.dot_dimension_numbers<[1], [0], [0], [1], [0, 0, 1, 1], [], []>} : vector<8x128xbf16>, vector<128x512xbf16>, vector<8x512xf32> -> vector<8x512xf32>
    %187 = arith.addf %184, %186 : vector<8x512xf32>
    %188 = vector.extract_strided_slice %187 {offsets = [0, 0], sizes = [8, 256], strides = [1, 1]} : vector<8x512xf32> to vector<8x256xf32>
    %189 = arith.negf %188 : vector<8x256xf32>
    %190 = math.exp %189 : vector<8x256xf32>
    %cst_31 = arith.constant 1.000000e+00 : f32
    %191 = vector.broadcast %cst_31 : f32 to vector<8x256xf32>
    %192 = arith.addf %191, %190 : vector<8x256xf32>
    %193 = arith.divf %191, %192 : vector<8x256xf32>
    %194 = vector.extract_strided_slice %193 {offsets = [0, 0], sizes = [8, 128], strides = [1, 1]} : vector<8x256xf32> to vector<8x128xf32>
    %195 = vector.extract_strided_slice %193 {offsets = [0, 128], sizes = [8, 128], strides = [1, 1]} : vector<8x256xf32> to vector<8x128xf32>
    %196 = vector.extract_strided_slice %187 {offsets = [0, 256], sizes = [8, 128], strides = [1, 1]} : vector<8x512xf32> to vector<8x128xf32>
    %197 = math.tanh %196 : vector<8x128xf32>
    %198 = vector.extract_strided_slice %187 {offsets = [0, 384], sizes = [8, 128], strides = [1, 1]} : vector<8x512xf32> to vector<8x128xf32>
    %199 = arith.negf %198 : vector<8x128xf32>
    %200 = math.exp %199 : vector<8x128xf32>
    %cst_32 = arith.constant 1.000000e+00 : f32
    %201 = vector.broadcast %cst_32 : f32 to vector<8x128xf32>
    %202 = arith.addf %201, %200 : vector<8x128xf32>
    %203 = arith.divf %201, %202 : vector<8x128xf32>
    %204 = arith.mulf %195, %181 : vector<8x128xf32>
    %205 = arith.mulf %194, %197 : vector<8x128xf32>
    %206 = arith.addf %204, %205 : vector<8x128xf32>
    %207 = math.tanh %206 : vector<8x128xf32>
    %208 = arith.mulf %203, %207 : vector<8x128xf32>
    %209 = arith.truncf %208 : vector<8x128xf32> to vector<8x128xbf16>
    %c0_33 = arith.constant 0 : index
    %c0_34 = arith.constant 0 : index
    %210 = vector.load %arg5[%c0_33, %c0_34] : memref<128x128xbf16, #tpu.memory_space<vmem>>, vector<128x128xbf16>
    %cst_35 = arith.constant dense<0.000000e+00> : vector<8x128xf32>
    %211 = tpu.matmul %209, %210, %cst_35 {dimension_numbers = #tpu.dot_dimension_numbers<[1], [0], [0], [1], [0, 0, 1, 1], [], []>} : vector<8x128xbf16>, vector<128x128xbf16>, vector<8x128xf32> -> vector<8x128xf32>
    %c0_36 = arith.constant 0 : index
    %c0_37 = arith.constant 0 : index
    %212 = vector.load %arg6[%c0_36, %c0_37] : memref<1x128xf32, #tpu.memory_space<vmem>>, vector<1x128xf32>
    %213 = vector.broadcast %212 : vector<1x128xf32> to vector<8x128xf32>
    %214 = arith.addf %211, %213 : vector<8x128xf32>
    %c0_38 = arith.constant 0 : index
    %c0_39 = arith.constant 0 : index
    %215 = vector.load %arg7[%c0_38, %c0_39] : memref<8x128xf32, #tpu.memory_space<vmem>>, vector<8x128xf32>
    tpu.vector_store %arg7[%c0_38, %c0_39], %214 {strides = array<i32>} : memref<8x128xf32, #tpu.memory_space<vmem>>, vector<8x128xf32>,
    return
  }
  func.func @transform_0(%arg0: i32) -> (i32, i32) {
    %c0_i32 = arith.constant 0 : i32
    %c0_i32_0 = arith.constant 0 : i32
    %c0_i32_1 = arith.constant 0 : i32
    return %c0_i32, %c0_i32_0 : i32, i32
  }
  func.func @transform_1(%arg0: i32) -> (i32, i32) {
    %c0_i32 = arith.constant 0 : i32
    %c0_i32_0 = arith.constant 0 : i32
    %c0_i32_1 = arith.constant 0 : i32
    return %c0_i32, %c0_i32_0 : i32, i32
  }
  func.func @transform_2(%arg0: i32) -> (i32, i32) {
    %c0_i32 = arith.constant 0 : i32
    %c0_i32_0 = arith.constant 0 : i32
    %c0_i32_1 = arith.constant 0 : i32
    return %c0_i32, %c0_i32_0 : i32, i32
  }
  func.func @transform_3(%arg0: i32) -> (i32, i32) {
    %c0_i32 = arith.constant 0 : i32
    %c0_i32_0 = arith.constant 0 : i32
    %c0_i32_1 = arith.constant 0 : i32
    return %c0_i32, %c0_i32_0 : i32, i32
  }
  func.func @transform_4(%arg0: i32) -> (i32, i32) {
    %c0_i32 = arith.constant 0 : i32
    %c0_i32_0 = arith.constant 0 : i32
    %c0_i32_1 = arith.constant 0 : i32
    return %c0_i32, %c0_i32_0 : i32, i32
  }
  func.func @transform_5(%arg0: i32) -> (i32, i32) {
    %c0_i32 = arith.constant 0 : i32
    %c0_i32_0 = arith.constant 0 : i32
    %c0_i32_1 = arith.constant 0 : i32
    return %c0_i32, %c0_i32_0 : i32, i32
  }
  func.func @transform_6(%arg0: i32) -> (i32, i32) {
    %c0_i32 = arith.constant 0 : i32
    %c0_i32_0 = arith.constant 0 : i32
    %c0_i32_1 = arith.constant 0 : i32
    return %c0_i32, %c0_i32_0 : i32, i32
  }
}

</mosaic_0001>

<bundles_post_ra>
// kernel: lstm_classifier_forward.1
= control target key start
LH: loop header
LB: loop body
LE: loop exit
PB: predicated region body
PF: predicated region fallthrough
CT: control target
= control target key end

     0   :  { %s3120_s0 = inlined_call_operand.vmem [shape: bf16[64,128], index: 0, kind: input, shape index: {}]   ;;  %s3121_s1 = inlined_call_operand.vmem [shape: bf16[128,512], index: 1, kind: input, shape index: {}]   ;;  %s3122_s2 = inlined_call_operand.vmem [shape: bf16[128,512], index: 2, kind: input, shape index: {}]   ;;  %s3123_s3 = inlined_call_operand.vmem [shape: f32[1,512], index: 3, kind: input, shape index: {}]   ;;  %s3124_s4 = inlined_call_operand.vmem [shape: bf16[128,128], index: 4, kind: input, shape index: {}]   ;;  %s3125_s5 = inlined_call_operand.vmem [shape: f32[1,128], index: 5, kind: input, shape index: {}]   ;;  %s3126_s6 = inlined_call_operand.hbm [shape: f32[8,128], index: 6, kind: output, shape index: {}]  }
   0x1   :  { %v1755_v0 = vld [vmem:[%s3121_s1 + $0xe0] sm:$0xf]  ;;  %v1987_v1 = vld [vmem:[%s3121_s1 + $0xec] sm:$0xf0]  ;;  %v1985_v2 = vld [vmem:[%s3121_s1 + $0xe4] sm:$0xf] }
   0x2   :  { %v1756_v3 = vor.u32 %v1987_v1, %v1755_v0  ;;  %v1757_v4 = vld [vmem:[%s3121_s1 + $0xf0] sm:$0xf0]  ;;  %v1763_v5 = vld [vmem:[%s3121_s1 + $0xe8] sm:$0xf]  ;;  %v1988_v6 = vld [vmem:[%s3121_s1 + $0xf4] sm:$0xf0] }
   0x3   :  { %v1760_v7 = vor.u32 %v1985_v2, %v1757_v4  ;;  %v1764_v8 = vor.u32 %v1988_v6, %v1763_v5  ;;  %v1986_v9 = vld [vmem:[%s3121_s1 + $0xec] sm:$0xf]  ;;  %v1765_v10 = vld [vmem:[%s3121_s1 + $0xf8] sm:$0xf0]  ;;  %v1739_v11 = vld [vmem:[%s3121_s1 + $0xc0] sm:$0xf] }
   0x4   :  { %259 = vmatpush.bf16.msra.mxu0 %v1756_v3  ;;  %v1768_v12 = vor.u32 %v1986_v9, %v1765_v10  ;;  %v1983_v13 = vld [vmem:[%s3121_s1 + $0xcc] sm:$0xf0]  ;;  %v1981_v14 = vld [vmem:[%s3121_s1 + $0xc4] sm:$0xf]  ;;  %v1741_v15 = vld [vmem:[%s3121_s1 + $0xd0] sm:$0xf0] }
   0x5   :  { %288 = vmatpush.bf16.msra.mxu1 %v1760_v7  ;;  %317 = vmatpush.bf16.msra.mxu2 %v1764_v8  ;;  %v1740_v16 = vor.u32 %v1983_v13, %v1739_v11  ;;  %v1744_v17 = vor.u32 %v1981_v14, %v1741_v15  ;;  %v1747_v18 = vld [vmem:[%s3121_s1 + $0xc8] sm:$0xf]  ;;  %v1984_v19 = vld [vmem:[%s3121_s1 + $0xd4] sm:$0xf0]  ;;  %v1982_v20 = vld [vmem:[%s3121_s1 + $0xcc] sm:$0xf] }
   0x6   :  { %346 = vmatpush.bf16.msra.mxu3 %v1768_v12  ;;  %v1748_v21 = vor.u32 %v1984_v19, %v1747_v18  ;;  %v1749_v22 = vld [vmem:[%s3121_s1 + $0xd8] sm:$0xf0]  ;;  %v1723_v23 = vld [vmem:[%s3121_s1 + $0xa0] sm:$0xf]  ;;  %v1979_v24 = vld [vmem:[%s3121_s1 + $0xac] sm:$0xf0] }
   0x7   :  { %v1752_v25 = vor.u32 %v1982_v20, %v1749_v22  ;;  %v1977_v26 = vld [vmem:[%s3121_s1 + $0xa4] sm:$0xf]  ;;  %v1725_v27 = vld [vmem:[%s3121_s1 + $0xb0] sm:$0xf0]  ;;  %v1731_v28 = vld [vmem:[%s3121_s1 + $0xa8] sm:$0xf]  ;;  %v1724_v29 = vor.u32 %v1979_v24, %v1723_v23 }
   0x8   :  { %260 = vmatpush.bf16.msra.mxu0 %v1740_v16  ;;  %v1980_v30 = vld [vmem:[%s3121_s1 + $0xb4] sm:$0xf0]  ;;  %v1978_v31 = vld [vmem:[%s3121_s1 + $0xac] sm:$0xf]  ;;  %v1733_v32 = vld [vmem:[%s3121_s1 + $0xb8] sm:$0xf0]  ;;  %v1728_v33 = vor.u32 %v1977_v26, %v1725_v27 }
   0x9   :  { %289 = vmatpush.bf16.msra.mxu1 %v1744_v17  ;;  %318 = vmatpush.bf16.msra.mxu2 %v1748_v21  ;;  %v1732_v34 = vor.u32 %v1980_v30, %v1731_v28  ;;  %v1707_v35 = vld [vmem:[%s3121_s1 + $0x80] sm:$0xf]  ;;  %v1975_v36 = vld [vmem:[%s3121_s1 + $0x8c] sm:$0xf0]  ;;  %v1973_v37 = vld [vmem:[%s3121_s1 + $0x84] sm:$0xf]  ;;  %v1736_v38 = vor.u32 %v1978_v31, %v1733_v32 }
   0xa   :  { %347 = vmatpush.bf16.msra.mxu3 %v1752_v25  ;;  %v1709_v39 = vld [vmem:[%s3121_s1 + $0x90] sm:$0xf0]  ;;  %v1715_v40 = vld [vmem:[%s3121_s1 + $0x88] sm:$0xf]  ;;  %v1976_v41 = vld [vmem:[%s3121_s1 + $0x94] sm:$0xf0]  ;;  %v1708_v44 = vor.u32 %v1975_v36, %v1707_v35 }
   0xb   :  { %v1974_v42 = vld [vmem:[%s3121_s1 + $0x8c] sm:$0xf]  ;;  %v1717_v43 = vld [vmem:[%s3121_s1 + $0x98] sm:$0xf0]  ;;  %v1712_v45 = vor.u32 %v1973_v37, %v1709_v39  ;;  %v1716_v46 = vor.u32 %v1976_v41, %v1715_v40  ;;  %v1691_v47 = vld [vmem:[%s3121_s1 + $0x60] sm:$0xf] }
   0xc   :  { %261 = vmatpush.bf16.msra.mxu0 %v1724_v29  ;;  %v1971_v48 = vld [vmem:[%s3121_s1 + $0x6c] sm:$0xf0]  ;;  %v1969_v49 = vld [vmem:[%s3121_s1 + $0x64] sm:$0xf]  ;;  %v1720_v50 = vor.u32 %v1974_v42, %v1717_v43  ;;  %v1693_v51 = vld [vmem:[%s3121_s1 + $0x70] sm:$0xf0] }
   0xd   :  { %290 = vmatpush.bf16.msra.mxu1 %v1728_v33  ;;  %319 = vmatpush.bf16.msra.mxu2 %v1732_v34  ;;  %v1699_v52 = vld [vmem:[%s3121_s1 + $0x68] sm:$0xf]  ;;  %v1972_v53 = vld [vmem:[%s3121_s1 + $0x74] sm:$0xf0]  ;;  %v1970_v54 = vld [vmem:[%s3121_s1 + $0x6c] sm:$0xf]  ;;  %v1692_v56 = vor.u32 %v1971_v48, %v1691_v47  ;;  %v1696_v57 = vor.u32 %v1969_v49, %v1693_v51 }
   0xe   :  { %348 = vmatpush.bf16.msra.mxu3 %v1736_v38  ;;  %v1701_v55 = vld [vmem:[%s3121_s1 + $0x78] sm:$0xf0]  ;;  %v1700_v58 = vor.u32 %v1972_v53, %v1699_v52  ;;  %v1675_v59 = vld [vmem:[%s3121_s1 + $0x40] sm:$0xf]  ;;  %v1967_v60 = vld [vmem:[%s3121_s1 + $0x4c] sm:$0xf0] }
   0xf   :  { %v1965_v61 = vld [vmem:[%s3121_s1 + $0x44] sm:$0xf]  ;;  %v1704_v62 = vor.u32 %v1970_v54, %v1701_v55  ;;  %v1677_v63 = vld [vmem:[%s3121_s1 + $0x50] sm:$0xf0]  ;;  %v1683_v0 = vld [vmem:[%s3121_s1 + $0x48] sm:$0xf]  ;;  %v1676_v4 = vor.u32 %v1967_v60, %v1675_v59 }
  0x10   :  { %262 = vmatpush.bf16.msra.mxu0 %v1708_v44  ;;  %v1968_v1 = vld [vmem:[%s3121_s1 + $0x54] sm:$0xf0]  ;;  %v1966_v2 = vld [vmem:[%s3121_s1 + $0x4c] sm:$0xf]  ;;  %v1685_v3 = vld [vmem:[%s3121_s1 + $0x58] sm:$0xf0]  ;;  %v1680_v5 = vor.u32 %v1965_v61, %v1677_v63 }
  0x11   :  { %291 = vmatpush.bf16.msra.mxu1 %v1712_v45  ;;  %320 = vmatpush.bf16.msra.mxu2 %v1716_v46  ;;  %v1684_v6 = vor.u32 %v1968_v1, %v1683_v0  ;;  %v1659_v7 = vld [vmem:[%s3121_s1 + $0x20] sm:$0xf]  ;;  %v1963_v8 = vld [vmem:[%s3121_s1 + $0x2c] sm:$0xf0]  ;;  %v1961_v9 = vld [vmem:[%s3121_s1 + $0x24] sm:$0xf]  ;;  %v1688_v10 = vor.u32 %v1966_v2, %v1685_v3 }
  0x12   :  { %349 = vmatpush.bf16.msra.mxu3 %v1720_v50  ;;  %v1661_v11 = vld [vmem:[%s3121_s1 + $0x30] sm:$0xf0]  ;;  %v1667_v12 = vld [vmem:[%s3121_s1 + $0x28] sm:$0xf]  ;;  %v1964_v13 = vld [vmem:[%s3121_s1 + $0x34] sm:$0xf0]  ;;  %v1660_v16 = vor.u32 %v1963_v8, %v1659_v7 }
  0x13   :  { %v1962_v14 = vld [vmem:[%s3121_s1 + $0x2c] sm:$0xf]  ;;  %v1669_v15 = vld [vmem:[%s3121_s1 + $0x38] sm:$0xf0]  ;;  %v1643_v17 = vld [vmem:[%s3121_s1] sm:$0xf]  ;;  %v1664_v18 = vor.u32 %v1961_v9, %v1661_v11  ;;  %v1668_v19 = vor.u32 %v1964_v13, %v1667_v12 }
  0x14   :  { %263 = vmatpush.bf16.msra.mxu0 %v1692_v56  ;;  %v1959_v20 = vld [vmem:[%s3121_s1 + $0xc] sm:$0xf0]  ;;  %v1957_v21 = vld [vmem:[%s3121_s1 + $0x4] sm:$0xf]  ;;  %v1645_v22 = vld [vmem:[%s3121_s1 + $0x10] sm:$0xf0]  ;;  %v1672_v23 = vor.u32 %v1962_v14, %v1669_v15 }
  0x15   :  { %292 = vmatpush.bf16.msra.mxu1 %v1696_v57  ;;  %321 = vmatpush.bf16.msra.mxu2 %v1700_v58  ;;  %v1651_v24 = vld [vmem:[%s3121_s1 + $0x8] sm:$0xf]  ;;  %v1960_v25 = vld [vmem:[%s3121_s1 + $0x14] sm:$0xf0]  ;;  %v1958_v26 = vld [vmem:[%s3121_s1 + $0xc] sm:$0xf]  ;;  %v1644_v30 = vor.u32 %v1959_v20, %v1643_v17  ;;  %v1648_v33 = vor.u32 %v1957_v21, %v1645_v22 }
  0x16   :  { %350 = vmatpush.bf16.msra.mxu3 %v1704_v62  ;;  %v1653_v27 = vld [vmem:[%s3121_s1 + $0x18] sm:$0xf0]  ;;  %v1883_v28 = vld [vmem:[%s3122_s2 + $0xe0] sm:$0xf]  ;;  %v2019_v29 = vld [vmem:[%s3122_s2 + $0xec] sm:$0xf0]  ;;  %v1652_v34 = vor.u32 %v1960_v25, %v1651_v24 }
  0x17   :  { %v2017_v31 = vld [vmem:[%s3122_s2 + $0xe4] sm:$0xf]  ;;  %v1885_v32 = vld [vmem:[%s3122_s2 + $0xf0] sm:$0xf0]  ;;  %v1656_v36 = vor.u32 %v1958_v26, %v1653_v27  ;;  %v2430_v37 = vor.u32 %v2019_v29, %v1883_v28  ;;  %v2018_v38 = vld [vmem:[%s3122_s2 + $0xec] sm:$0xf] }
  0x18   :  { %264 = vmatpush.bf16.msra.mxu0 %v1676_v4  ;;  %v1953_v35 = vld [vmem:[%s3120_s0] sm:$0xff]  ;;  %v1891_v39 = vld [vmem:[%s3122_s2 + $0xe8] sm:$0xf]  ;;  %v2020_v40 = vld [vmem:[%s3122_s2 + $0xf4] sm:$0xf0]  ;;  %v2441_v41 = vor.u32 %v2017_v31, %v1885_v32 }
  0x19   :  { %293 = vmatpush.bf16.msra.mxu1 %v1680_v5  ;;  %322 = vmatpush.bf16.msra.mxu2 %v1684_v6  ;;  %v1893_v42 = vld [vmem:[%s3122_s2 + $0xf8] sm:$0xf0]  ;;  %v1867_v43 = vld [vmem:[%s3122_s2 + $0xc0] sm:$0xf]  ;;  %v2015_v44 = vld [vmem:[%s3122_s2 + $0xcc] sm:$0xf0]  ;;  %v2458_v47 = vor.u32 %v2020_v40, %v1891_v39 }
  0x1a   :  { %351 = vmatpush.bf16.msra.mxu3 %v1688_v10  ;;  %v2013_v45 = vld [vmem:[%s3122_s2 + $0xc4] sm:$0xf]  ;;  %v1869_v46 = vld [vmem:[%s3122_s2 + $0xd0] sm:$0xf0] }
  0x1c   :  { %265 = vmatpush.bf16.msra.mxu0 %v1660_v16 }
  0x1d   :  { %294 = vmatpush.bf16.msra.mxu1 %v1664_v18  ;;  %323 = vmatpush.bf16.msra.mxu2 %v1668_v19 }
  0x1e   :  { %352 = vmatpush.bf16.msra.mxu3 %v1672_v23 }
  0x20   :  { %266 = vmatpush.bf16.msra.mxu0 %v1644_v30 }
  0x21   :  { %295 = vmatpush.bf16.msra.mxu1 %v1648_v33  ;;  %324 = vmatpush.bf16.msra.mxu2 %v1652_v34 }
  0x22   :  { %11 = vsyncpa [#allocation3], 0  ;;  %353 = vmatpush.bf16.msra.mxu3 %v1656_v36  ;;  %v2461_v48 = vor.u32 %v2018_v38, %v1893_v42  ;;  %v2463_v49 = vor.u32 %v2015_v44, %v1867_v43  ;;  %v2014_v50 = vld [vmem:[%s3122_s2 + $0xcc] sm:$0xf]  ;;  %v1875_v51 = vld [vmem:[%s3122_s2 + $0xc8] sm:$0xf]  ;;  %v2475_v53 = vor.u32 %v2013_v45, %v1869_v46 }
  0x23   :  { %v2016_v52 = vld [vmem:[%s3122_s2 + $0xd4] sm:$0xf0]  ;;  %267 = vmatmul.bf16.vlgmr.msra.gmra.mxu0 %v1953_v35  ;;  %v1877_v54 = vld [vmem:[%s3122_s2 + $0xd8] sm:$0xf0]  ;;  %v1851_v55 = vld [vmem:[%s3122_s2 + $0xa0] sm:$0xf] }
  0x24   :  { %567 = vmatpush.bf16.msrb.mxu0 %v2430_v37  ;;  %v2011_v56 = vld [vmem:[%s3122_s2 + $0xac] sm:$0xf0]  ;;  %296 = vmatmul.bf16.vlgmr.msra.gmra.mxu1 %v1953_v35  ;;  %v2009_v57 = vld [vmem:[%s3122_s2 + $0xa4] sm:$0xf]  ;;  %v1853_v58 = vld [vmem:[%s3122_s2 + $0xb0] sm:$0xf0]  ;;  %v2493_v59 = vor.u32 %v2016_v52, %v1875_v51  ;;  %v2497_v60 = vor.u32 %v2014_v50, %v1877_v54 }
  0x25   :  { %580 = vmatpush.bf16.msrb.mxu1 %v2441_v41  ;;  %325 = vmatmul.bf16.vlgmr.msra.gmra.mxu2 %v1953_v35  ;;  %v2499_v61 = vor.u32 %v2011_v56, %v1851_v55  ;;  %v2010_v62 = vld [vmem:[%s3122_s2 + $0xac] sm:$0xf]  ;;  %v1859_v63 = vld [vmem:[%s3122_s2 + $0xa8] sm:$0xf]  ;;  %v2012_v0 = vld [vmem:[%s3122_s2 + $0xb4] sm:$0xf0]  ;;  %v2511_v1 = vor.u32 %v2009_v57, %v1853_v58 }
  0x26   :  { %354 = vmatmul.bf16.vlgmr.msra.gmra.mxu3 %v1953_v35  ;;  %593 = vmatpush.bf16.msrb.mxu2 %v2458_v47  ;;  %v1861_v2 = vld [vmem:[%s3122_s2 + $0xb8] sm:$0xf0]  ;;  %v1835_v3 = vld [vmem:[%s3122_s2 + $0x80] sm:$0xf]  ;;  %v2007_v4 = vld [vmem:[%s3122_s2 + $0x8c] sm:$0xf0]  ;;  %v2529_v7 = vor.u32 %v2012_v0, %v1859_v63 }
  0x27   :  { %606 = vmatpush.bf16.msrb.mxu3 %v2461_v48  ;;  %v2005_v5 = vld [vmem:[%s3122_s2 + $0x84] sm:$0xf]  ;;  %v1837_v6 = vld [vmem:[%s3122_s2 + $0x90] sm:$0xf0]  ;;  %v2533_v8 = vor.u32 %v2010_v62, %v1861_v2  ;;  %v2535_v9 = vor.u32 %v2007_v4, %v1835_v3  ;;  %v2006_v10 = vld [vmem:[%s3122_s2 + $0x8c] sm:$0xf] }
  0x28   :  { %568 = vmatpush.bf16.msrb.mxu0 %v2463_v49  ;;  %v1843_v11 = vld [vmem:[%s3122_s2 + $0x88] sm:$0xf]  ;;  %v2008_v12 = vld [vmem:[%s3122_s2 + $0x94] sm:$0xf0]  ;;  %v2547_v13 = vor.u32 %v2005_v5, %v1837_v6  ;;  %v1845_v14 = vld [vmem:[%s3122_s2 + $0x98] sm:$0xf0] }
  0x29   :  { %581 = vmatpush.bf16.msrb.mxu1 %v2475_v53  ;;  %v1819_v15 = vld [vmem:[%s3122_s2 + $0x60] sm:$0xf]  ;;  %v2003_v16 = vld [vmem:[%s3122_s2 + $0x6c] sm:$0xf0]  ;;  %v2001_v17 = vld [vmem:[%s3122_s2 + $0x64] sm:$0xf]  ;;  %v2568_v20 = vor.u32 %v2008_v12, %v1843_v11  ;;  %v2572_v21 = vor.u32 %v2006_v10, %v1845_v14 }
  0x2a   :  { %594 = vmatpush.bf16.msrb.mxu2 %v2493_v59  ;;  %v1821_v18 = vld [vmem:[%s3122_s2 + $0x70] sm:$0xf0]  ;;  %v1954_v19 = vld [vmem:[%s3120_s0 + $0x8] sm:$0xff]  ;;  %v2574_v22 = vor.u32 %v2003_v16, %v1819_v15  ;;  %v2004_v25 = vld [vmem:[%s3122_s2 + $0x74] sm:$0xf0]  ;;  %s2187_s7 = smov [#allocation2]  }
  0x2b   :  { %607 = vmatpush.bf16.msrb.mxu3 %v2497_v60  ;;  %v2002_v23 = vld [vmem:[%s3122_s2 + $0x6c] sm:$0xf]  ;;  %v1827_v24 = vld [vmem:[%s3122_s2 + $0x68] sm:$0xf]  ;;  %v2586_v26 = vor.u32 %v2001_v17, %v1821_v18  ;;  %v1829_v27 = vld [vmem:[%s3122_s2 + $0x78] sm:$0xf0] }
  0x2c   :  { %569 = vmatpush.bf16.msrb.mxu0 %v2499_v61  ;;  %v1803_v28 = vld [vmem:[%s3122_s2 + $0x40] sm:$0xf]  ;;  %v1999_v29 = vld [vmem:[%s3122_s2 + $0x4c] sm:$0xf0]  ;;  %v1997_v30 = vld [vmem:[%s3122_s2 + $0x44] sm:$0xf]  ;;  %v2604_v32 = vor.u32 %v2004_v25, %v1827_v24  ;;  %v2608_v33 = vor.u32 %v2002_v23, %v1829_v27 }
  0x2d   :  { %582 = vmatpush.bf16.msrb.mxu1 %v2511_v1  ;;  %v1805_v31 = vld [vmem:[%s3122_s2 + $0x50] sm:$0xf0]  ;;  %v2610_v34 = vor.u32 %v1999_v29, %v1803_v28  ;;  %v1998_v36 = vld [vmem:[%s3122_s2 + $0x4c] sm:$0xf]  ;;  %v1813_v38 = vld [vmem:[%s3122_s2 + $0x58] sm:$0xf0] }
  0x2e   :  { %595 = vmatpush.bf16.msrb.mxu2 %v2529_v7  ;;  %v2613_v35 = vor.u32 %v1997_v30, %v1805_v31  ;;  %v1787_v39 = vld [vmem:[%s3122_s2 + $0x20] sm:$0xf]  ;;  %v1995_v40 = vld [vmem:[%s3122_s2 + $0x2c] sm:$0xf0]  ;;  %v1993_v42 = vld [vmem:[%s3122_s2 + $0x24] sm:$0xf]  ;;  %v2633_v43 = vor.u32 %v1998_v36, %v1813_v38 }
  0x2f   :  { %608 = vmatpush.bf16.msrb.mxu3 %v2533_v8  ;;  %v2635_v44 = vor.u32 %v1995_v40, %v1787_v39  ;;  %v1789_v45 = vld [vmem:[%s3122_s2 + $0x30] sm:$0xf0]  ;;  %v1811_v46 = vld [vmem:[%s3122_s2 + $0x48] sm:$0xf]  ;;  %v2000_v50 = vld [vmem:[%s3122_s2 + $0x54] sm:$0xf0] }
  0x30   :  { %570 = vmatpush.bf16.msrb.mxu0 %v2535_v9  ;;  %v2647_v51 = vor.u32 %v1993_v42, %v1789_v45  ;;  %v2649_v52 = vor.u32 %v2000_v50, %v1811_v46  ;;  %v1994_v54 = vld [vmem:[%s3122_s2 + $0x2c] sm:$0xf]  ;;  %v1797_v55 = vld [vmem:[%s3122_s2 + $0x38] sm:$0xf0]  ;;  %v1771_v56 = vld [vmem:[%s3122_s2] sm:$0xf] }
  0x31   :  { %583 = vmatpush.bf16.msrb.mxu1 %v2547_v13  ;;  %v1991_v57 = vld [vmem:[%s3122_s2 + $0xc] sm:$0xf0]  ;;  %v1989_v58 = vld [vmem:[%s3122_s2 + $0x4] sm:$0xf]  ;;  %v1773_v62 = vld [vmem:[%s3122_s2 + $0x10] sm:$0xf0]  ;;  %v2678_v2 = vor.u32 %v1994_v54, %v1797_v55 }
  0x32   :  { %596 = vmatpush.bf16.msrb.mxu2 %v2568_v20  ;;  %v1795_v63 = vld [vmem:[%s3122_s2 + $0x28] sm:$0xf]  ;;  %v1996_v0 = vld [vmem:[%s3122_s2 + $0x34] sm:$0xf0]  ;;  %v2680_v3 = vor.u32 %v1991_v57, %v1771_v56  ;;  %v2691_v10 = vor.u32 %v1989_v58, %v1773_v62  ;;  %v1990_v11 = vld [vmem:[%s3122_s2 + $0xc] sm:$0xf] }
  0x33   :  { %609 = vmatpush.bf16.msrb.mxu3 %v2572_v21  ;;  %272 = vmatmul.bf16.gmra.mxu0 %v1954_v19  ;;  %v2682_v4 = vor.u32 %v1996_v0, %v1795_v63  ;;  %v1779_v5 = vld [vmem:[%s3122_s2 + $0x8] sm:$0xf]  ;;  %v1992_v6 = vld [vmem:[%s3122_s2 + $0x14] sm:$0xf0]  ;;  %v1781_v12 = vld [vmem:[%s3122_s2 + $0x18] sm:$0xf0] }
  0x34   :  { %571 = vmatpush.bf16.msrb.mxu0 %v2574_v22  ;;  %301 = vmatmul.bf16.gmra.mxu1 %v1954_v19  ;;  %v2700_v14 = vor.u32 %v1992_v6, %v1779_v5  ;;  %v2704_v15 = vor.u32 %v1990_v11, %v1781_v12  ;;  %v1955_v16 = vld [vmem:[%s3120_s0 + $0x10] sm:$0xff]  ;;  %v1956_v17 = vld [vmem:[%s3120_s0 + $0x18] sm:$0xff]  ;;  %v2186_v18 = vmov 0   ;;  %v65_v24 = vld [vmem:[%s3123_s3] sm:$0xf]  ;;  %s1614_s8 = sshll.u32 %s2187_s7, 4  ;;  %s1615_s8 = int_to_ptr.vmem [resolvable:$true] %s1614_s8 }
  0x35   :  { %584 = vmatpush.bf16.msrb.mxu1 %v2586_v26  ;;  %330 = vmatmul.bf16.gmra.mxu2 %v1954_v19  ;;  %v68_v27 = vperm.slane %v65_v24, 1  ;;  %v2790_v36 = vperm.slane %v65_v24, 2  ;;  %v2792_v38 = vperm.slane %v65_v24, 0  ;;  %v2794_v39 = vperm.slane %v65_v24, 3  ;;  %s1616_s11 = sshll.u32 %s3126_s6, 4  ;;  %s1617_s11 = int_to_ptr.hbm [resolvable:$true] %s1616_s11 }
  0x36   :  { %359 = vmatmul.bf16.gmra.mxu3 %v1954_v19  ;;  %597 = vmatpush.bf16.msrb.mxu2 %v2604_v32 }
  0x37   :  { %610 = vmatpush.bf16.msrb.mxu3 %v2608_v33 }
  0x38   :  { %572 = vmatpush.bf16.msrb.mxu0 %v2610_v34 }
  0x39   :  { %585 = vmatpush.bf16.msrb.mxu1 %v2613_v35 }
  0x3a   :  { %598 = vmatpush.bf16.msrb.mxu2 %v2649_v52 }
  0x3b   :  { %611 = vmatpush.bf16.msrb.mxu3 %v2633_v43 }
  0x3c   :  { %573 = vmatpush.bf16.msrb.mxu0 %v2635_v44 }
  0x3d   :  { %586 = vmatpush.bf16.msrb.mxu1 %v2647_v51 }
  0x3e   :  { %599 = vmatpush.bf16.msrb.mxu2 %v2682_v4 }
  0x3f   :  { %612 = vmatpush.bf16.msrb.mxu3 %v2678_v2 }
  0x40   :  { %574 = vmatpush.bf16.msrb.mxu0 %v2680_v3 }
  0x41   :  { %587 = vmatpush.bf16.msrb.mxu1 %v2691_v10 }
  0x42   :  { %600 = vmatpush.bf16.msrb.mxu2 %v2700_v14 }
  0x43   :  { %613 = vmatpush.bf16.msrb.mxu3 %v2704_v15  ;;  %277 = vmatmul.bf16.gmra.mxu0 %v1955_v16 }
  0x44   :  { %687 = vmatpush.bf16.msra.mxu0 %v2430_v37  ;;  %306 = vmatmul.bf16.gmra.mxu1 %v1955_v16 }
  0x45   :  { %700 = vmatpush.bf16.msra.mxu1 %v2441_v41  ;;  %335 = vmatmul.bf16.gmra.mxu2 %v1955_v16 }
  0x46   :  { %713 = vmatpush.bf16.msra.mxu2 %v2458_v47  ;;  %364 = vmatmul.bf16.gmra.mxu3 %v1955_v16 }
  0x47   :  { %726 = vmatpush.bf16.msra.mxu3 %v2461_v48 }
  0x48   :  { %688 = vmatpush.bf16.msra.mxu0 %v2463_v49 }
  0x49   :  { %701 = vmatpush.bf16.msra.mxu1 %v2475_v53 }
  0x4a   :  { %714 = vmatpush.bf16.msra.mxu2 %v2493_v59 }
  0x4b   :  { %727 = vmatpush.bf16.msra.mxu3 %v2497_v60 }
  0x4c   :  { %689 = vmatpush.bf16.msra.mxu0 %v2499_v61 }
  0x4d   :  { %702 = vmatpush.bf16.msra.mxu1 %v2511_v1 }
  0x4e   :  { %715 = vmatpush.bf16.msra.mxu2 %v2529_v7 }
  0x4f   :  { %728 = vmatpush.bf16.msra.mxu3 %v2533_v8 }
  0x50   :  { %690 = vmatpush.bf16.msra.mxu0 %v2535_v9 }
  0x51   :  { %703 = vmatpush.bf16.msra.mxu1 %v2547_v13 }
  0x52   :  { %716 = vmatpush.bf16.msra.mxu2 %v2568_v20 }
  0x53   :  { %729 = vmatpush.bf16.msra.mxu3 %v2572_v21  ;;  %282 = vmatmul.bf16.gmra.mxu0 %v1956_v17 }
  0x54   :  { %691 = vmatpush.bf16.msra.mxu0 %v2574_v22  ;;  %311 = vmatmul.bf16.gmra.mxu1 %v1956_v17 }
  0x55   :  { %704 = vmatpush.bf16.msra.mxu1 %v2586_v26  ;;  %340 = vmatmul.bf16.gmra.mxu2 %v1956_v17 }
  0x56   :  { %717 = vmatpush.bf16.msra.mxu2 %v2604_v32  ;;  %369 = vmatmul.bf16.gmra.mxu3 %v1956_v17 }
  0x57   :  { %730 = vmatpush.bf16.msra.mxu3 %v2608_v33 }
  0x58   :  { %692 = vmatpush.bf16.msra.mxu0 %v2610_v34 }
  0x59   :  { %705 = vmatpush.bf16.msra.mxu1 %v2613_v35 }
  0x5a   :  { %718 = vmatpush.bf16.msra.mxu2 %v2649_v52 }
  0x5b   :  { %731 = vmatpush.bf16.msra.mxu3 %v2633_v43 }
  0x5c   :  { %693 = vmatpush.bf16.msra.mxu0 %v2635_v44 }
  0x5d   :  { %706 = vmatpush.bf16.msra.mxu1 %v2647_v51 }
  0x5e   :  { %719 = vmatpush.bf16.msra.mxu2 %v2682_v4 }
  0x5f   :  { %732 = vmatpush.bf16.msra.mxu3 %v2678_v2 }
  0x60   :  { %694 = vmatpush.bf16.msra.mxu0 %v2680_v3 }
  0x61   :  { %707 = vmatpush.bf16.msra.mxu1 %v2691_v10 }
  0x62   :  { %720 = vmatpush.bf16.msra.mxu2 %v2700_v14 }
  0x63   :  { %733 = vmatpush.bf16.msra.mxu3 %v2704_v15  ;;  %575 = vmatmul.bf16.vlgmr.msrb.gmra.mxu0 %v2186_v18 }
  0x64   :  { %588 = vmatmul.bf16.vlgmr.msrb.gmra.mxu1 %v2186_v18  ;;  %807 = vmatpush.bf16.msrb.mxu0 %v2430_v37 }
  0x65   :  { %601 = vmatmul.bf16.vlgmr.msrb.gmra.mxu2 %v2186_v18  ;;  %820 = vmatpush.bf16.msrb.mxu1 %v2441_v41 }
  0x66   :  { %614 = vmatmul.bf16.vlgmr.msrb.gmra.mxu3 %v2186_v18  ;;  %833 = vmatpush.bf16.msrb.mxu2 %v2458_v47 }
  0x67   :  { %846 = vmatpush.bf16.msrb.mxu3 %v2461_v48 }
  0x68   :  { %808 = vmatpush.bf16.msrb.mxu0 %v2463_v49 }
  0x69   :  { %821 = vmatpush.bf16.msrb.mxu1 %v2475_v53 }
  0x6a   :  { %834 = vmatpush.bf16.msrb.mxu2 %v2493_v59 }
  0x6b   :  { %847 = vmatpush.bf16.msrb.mxu3 %v2497_v60 }
  0x6c   :  { %809 = vmatpush.bf16.msrb.mxu0 %v2499_v61 }
  0x6d   :  { %822 = vmatpush.bf16.msrb.mxu1 %v2511_v1 }
  0x6e   :  { %835 = vmatpush.bf16.msrb.mxu2 %v2529_v7 }
  0x6f   :  { %848 = vmatpush.bf16.msrb.mxu3 %v2533_v8 }
  0x70   :  { %810 = vmatpush.bf16.msrb.mxu0 %v2535_v9 }
  0x71   :  { %823 = vmatpush.bf16.msrb.mxu1 %v2547_v13 }
  0x72   :  { %836 = vmatpush.bf16.msrb.mxu2 %v2568_v20 }
  0x73   :  { %849 = vmatpush.bf16.msrb.mxu3 %v2572_v21 }
  0x74   :  { %811 = vmatpush.bf16.msrb.mxu0 %v2574_v22 }
  0x75   :  { %824 = vmatpush.bf16.msrb.mxu1 %v2586_v26 }
  0x76   :  { %837 = vmatpush.bf16.msrb.mxu2 %v2604_v32 }
  0x77   :  { %850 = vmatpush.bf16.msrb.mxu3 %v2608_v33 }
  0x78   :  { %812 = vmatpush.bf16.msrb.mxu0 %v2610_v34 }
  0x79   :  { %825 = vmatpush.bf16.msrb.mxu1 %v2613_v35 }
  0x7a   :  { %838 = vmatpush.bf16.msrb.mxu2 %v2649_v52 }
  0x7b   :  { %851 = vmatpush.bf16.msrb.mxu3 %v2633_v43 }
  0x7c   :  { %813 = vmatpush.bf16.msrb.mxu0 %v2635_v44 }
  0x7d   :  { %826 = vmatpush.bf16.msrb.mxu1 %v2647_v51 }
  0x7e   :  { %839 = vmatpush.bf16.msrb.mxu2 %v2682_v4 }
  0x7f   :  { %852 = vmatpush.bf16.msrb.mxu3 %v2678_v2 }
  0x80   :  { %814 = vmatpush.bf16.msrb.mxu0 %v2680_v3 }
  0x81   :  { %827 = vmatpush.bf16.msrb.mxu1 %v2691_v10 }
  0x82   :  { %840 = vmatpush.bf16.msrb.mxu2 %v2700_v14 }
  0x83   :  { %853 = vmatpush.bf16.msrb.mxu3 %v2704_v15 }
  0xa0   :  { %v268_v19 = vpop.f32.mrf.mxu0 }
  0xa1   :  { %v297_v23 = vpop.f32.mrf.mxu1 }
  0xa8   :  { %v2782_v25 = vpop.f32.mrf.mxu2  ;;  %v2786_v29 = vpop.f32.mrf.mxu0 }
  0xa9   :  { %v2784_v28 = vpop.f32.mrf.mxu3  ;;  %v299_v30 = vpop.f32.mrf.mxu1 }
  0xaa   :  { %v2788_v31 = vadd.f32 %v299_v30, %v68_v27 }
  0xb0   :  { %v328_v40 = vpop.f32.mrf.mxu2  ;;  %v273_v46 = vpop.f32.mrf.mxu0 }
  0xb1   :  { %v2797_v42 = vadd.f32 %v328_v40, %v2790_v36  ;;  %v357_v45 = vpop.f32.mrf.mxu3  ;;  %v2803_v54 = vadd.f32 %v273_v46, %v2792_v38  ;;  %v302_v55 = vpop.f32.mrf.mxu1 }
  0xb2   :  { %v2800_v50 = vadd.f32 %v357_v45, %v2794_v39  ;;  %v2805_v56 = vadd.f32 %v302_v55, %v68_v27 }
  0xb8   :  { %v331_v57 = vpop.f32.mrf.mxu2  ;;  %v275_v63 = vpop.f32.mrf.mxu0 }
  0xb9   :  { %v2808_v58 = vadd.f32 %v331_v57, %v2790_v36  ;;  %v360_v62 = vpop.f32.mrf.mxu3  ;;  %v2814_v5 = vadd.f32 %v275_v63, %v2792_v38  ;;  %v304_v6 = vpop.f32.mrf.mxu1 }
  0xba   :  { %v2811_v0 = vadd.f32 %v360_v62, %v2794_v39  ;;  %v2816_v11 = vadd.f32 %v304_v6, %v68_v27 }
  0xbb   :  { %3127 = vst [vmem:[#allocation5_spill] sm:$0xff] %v2808_v58 }
  0xbc   :  { %3128 = vst [vmem:[#allocation6_spill] sm:$0xff] %v2811_v0 }
  0xbd   :  { %3129 = vst [vmem:[#allocation7_spill] sm:$0xff] %v2814_v5 }
  0xbe   :  { %3130 = vst [vmem:[#allocation8_spill] sm:$0xff] %v2816_v11 }
  0xc0   :  { %v333_v12 = vpop.f32.mrf.mxu2  ;;  %v278_v18 = vpop.f32.mrf.mxu0 }
  0xc1   :  { %v2819_v16 = vadd.f32 %v333_v12, %v2790_v36  ;;  %v362_v17 = vpop.f32.mrf.mxu3  ;;  %v2825_v30 = vadd.f32 %v278_v18, %v2792_v38  ;;  %v307_v40 = vpop.f32.mrf.mxu1 }
  0xc2   :  { %v2822_v24 = vadd.f32 %v362_v17, %v2794_v39  ;;  %v2827_v45 = vadd.f32 %v307_v40, %v68_v27 }
  0xc3   :  { %3131 = vst [vmem:[#allocation9_spill] sm:$0xff] %v2819_v16 }
  0xc4   :  { %3132 = vst [vmem:[#allocation10_spill] sm:$0xff] %v2822_v24 }
  0xc5   :  { %3133 = vst [vmem:[#allocation11_spill] sm:$0xff] %v2825_v30 }
  0xc6   :  { %3134 = vst [vmem:[#allocation12_spill] sm:$0xff] %v2827_v45 }
  0xc8   :  { %v336_v46 = vpop.f32.mrf.mxu2  ;;  %v280_v62 = vpop.f32.mrf.mxu0 }
  0xc9   :  { %v2830_v55 = vadd.f32 %v336_v46, %v2790_v36  ;;  %v365_v57 = vpop.f32.mrf.mxu3  ;;  %v2836_v6 = vadd.f32 %v280_v62, %v2792_v38  ;;  %v309_v12 = vpop.f32.mrf.mxu1 }
  0xca   :  { %v2833_v63 = vadd.f32 %v365_v57, %v2794_v39  ;;  %v2838_v17 = vadd.f32 %v309_v12, %v68_v27 }
  0xcb   :  { %3135 = vst [vmem:[#allocation13_spill] sm:$0xff] %v2830_v55 }
  0xcc   :  { %3136 = vst [vmem:[#allocation14_spill] sm:$0xff] %v2833_v63 }
  0xcd   :  { %3137 = vst [vmem:[#allocation15_spill] sm:$0xff] %v2836_v6 }
  0xce   :  { %3138 = vst [vmem:[#allocation16_spill] sm:$0xff] %v2838_v17 }
  0xd0   :  { %v338_v18 = vpop.f32.mrf.mxu2  ;;  %v283_v45 = vpop.f32.mrf.mxu0 }
  0xd1   :  { %v2841_v30 = vadd.f32 %v338_v18, %v2790_v36  ;;  %v367_v40 = vpop.f32.mrf.mxu3  ;;  %v2847_v55 = vadd.f32 %v283_v45, %v2792_v38  ;;  %v312_v57 = vpop.f32.mrf.mxu1  ;;  %v269_v45 = vadd.f32 %v268_v19, %v2792_v38  ;;  %v356_v19 = vadd.f32 %v2784_v28, %v2794_v39 }
  0xd2   :  { %v2844_v46 = vadd.f32 %v367_v40, %v2794_v39  ;;  %v2849_v63 = vadd.f32 %v312_v57, %v68_v27  ;;  %v298_v57 = vadd.f32 %v297_v23, %v68_v27 }
  0xd3   :  { %3139 = vst [vmem:[#allocation17_spill] sm:$0xff] %v2841_v30 }
  0xd4   :  { %3140 = vst [vmem:[#allocation18_spill] sm:$0xff] %v2844_v46 }
  0xd5   :  { %3141 = vst [vmem:[#allocation19_spill] sm:$0xff] %v2847_v55 }
  0xd6   :  { %3142 = vst [vmem:[#allocation20_spill] sm:$0xff] %v2849_v63 }
  0xd8   :  { %v341_v62 = vpop.f32.mrf.mxu2  ;;  %v285_v17 = vpop.f32.mrf.mxu0 }
  0xd9   :  { %v2852_v6 = vadd.f32 %v341_v62, %v2790_v36  ;;  %v370_v12 = vpop.f32.mrf.mxu3  ;;  %v2858_v30 = vadd.f32 %v285_v17, %v2792_v38  ;;  %v314_v40 = vpop.f32.mrf.mxu1 }
  0xda   :  { %v2855_v18 = vadd.f32 %v370_v12, %v2794_v39  ;;  %v2860_v46 = vadd.f32 %v314_v40, %v68_v27 }
  0xdb   :  { %3143 = vst [vmem:[#allocation21_spill] sm:$0xff] %v2852_v6 }
  0xdc   :  { %3144 = vst [vmem:[#allocation22_spill] sm:$0xff] %v2855_v18 }
  0xdd   :  { %3145 = vst [vmem:[#allocation23_spill] sm:$0xff] %v2858_v30 }
  0xde   :  { %3146 = vst [vmem:[#allocation24_spill] sm:$0xff] %v2860_v46 }
  0xe0   :  { %v343_v55 = vpop.f32.mrf.mxu2  ;;  %v576_v6 = vpop.f32.mrf.mxu0 }
  0xe1   :  { %v2864_v63 = vadd.f32 %v343_v55, %v2790_v36  ;;  %v372_v62 = vpop.f32.mrf.mxu3  ;;  %v619_v12 = vadd.f32 %v576_v6, %v269_v45  ;;  %v589_v18 = vpop.f32.mrf.mxu1 }
  0xe2   :  { %v2867_v16 = vadd.f32 %v372_v62, %v2794_v39  ;;  %v620_v24 = vadd.f32 %v589_v18, %v298_v57 }
  0xe3   :  { %3147 = vst [vmem:[#allocation25_spill] sm:$0xff] %v2864_v63  ;;  %v1897_v17 = vmul.f32 -1.442695, %v619_v12 }
  0xe4   :  { %3148 = vst [vmem:[#allocation26_spill] sm:$0xff] %v2867_v16  ;;  %v1898_v30 = vmul.f32 -1.442695, %v620_v24 }
  0xe5   :  { %2032 = vpow2.f32 %v1897_v17 }
  0xe6   :  { %2034 = vpow2.f32 %v1898_v30  ;;  %v327_v30 = vadd.f32 %v2782_v25, %v2790_v36 }
  0xe8   :  { %v602_v40 = vpop.f32.mrf.mxu2  ;;  %v578_v27 = vpop.f32.mrf.mxu0 }
  0xe9   :  { %v615_v23 = vpop.f32.mrf.mxu3  ;;  %v591_v63 = vpop.f32.mrf.mxu1  ;;  %v621_v39 = vadd.f32 %v602_v40, %v327_v30 }
  0xea   :  { %v622_v55 = vadd.f32 %v615_v23, %v356_v19 }
  0xeb   :  { %v2033_v46 = vpop.eup %2032 }
  0xec   :  { %v1899_v11 = vmul.f32 -1.442695, %v622_v55  ;;  %v2035_v5 = vpop.eup %2034  ;;  %v629_v62 = vadd.f32 1.0, %v2033_v46 }
  0xed   :  { %v630_v16 = vadd.f32 1.0, %v2035_v5 }
  0xee   :  { %2036 = vpow2.f32 %v1899_v11  ;;  %v642_v46 = vand.u32 2147483648, %v629_v62  ;;  %v640_v23 = vand.u32 2147483647, %v629_v62  ;;  %vm636_vm2 = vweird.f32 %v629_v62 }
  0xef   :  { %2038 = vrcp.f32 %v629_v62  ;;  %v657_v5 = vand.u32 2147483648, %v630_v16  ;;  %v655_v55 = vand.u32 2147483647, %v630_v16  ;;  %vm651_vm3 = vweird.f32 %v630_v16 }
  0xf0   :  { %2040 = vrcp.f32 %v630_v16  ;;  %v604_v6 = vpop.f32.mrf.mxu2  ;;  %v643_v40 = vor.u32 1.1754944e-38, %v642_v46  ;;  %vm641_vm5 = vcmp.eq.f32.partialorder %v640_v23, 8.507059e+37 }
  0xf1   :  { %v617_v24 = vpop.f32.mrf.mxu3  ;;  %vm656_vm7 = vcmp.eq.f32.partialorder %v655_v55, 8.507059e+37 }
  0xf2   :  { %v658_v24 = vor.u32 1.1754944e-38, %v657_v5 }
  0xf4   :  { %v2037_v18 = vpop.eup %2036 }
  0xf5   :  { %v2039_v28 = vpop.eup %2038  ;;  %v665_v45 = vadd.f32 1.0, %v2037_v18 }
  0xf6   :  { %v2041_v57 = vpop.eup %2040  ;;  %v632_v12 = vmul.f32 %v2039_v28, %v629_v62  ;;  %vm637_vm0 = vweird.f32 %v2039_v28 }
  0xf7   :  { %v647_v63 = vmul.f32 %v2041_v57, %v630_v16  ;;  %2042 = vrcp.f32 %v665_v45  ;;  %vm652_vm1 = vweird.f32 %v2041_v57  ;;  %vm638_vm4 = vmor %vm636_vm2, %vm637_vm0  ;;  %v677_v46 = vand.u32 2147483648, %v665_v45 }
  0xf8   :  { %v633_v17 = vsub.f32 1.0, %v632_v12  ;;  %2044 = vtanh.f32 %v621_v39  ;;  %vm653_vm6 = vmor %vm651_vm3, %vm652_vm1  ;;  %vm671_vm9 = vweird.f32 %v665_v45 }
  0xf9   :  { %v648_v19 = vsub.f32 1.0, %v647_v63  ;;  %v678_v23 = vor.u32 1.1754944e-38, %v677_v46 }
  0xfa   :  { %v634_v11 = vmul.f32 %v2039_v28, %v633_v17 }
  0xfb   :  { %v649_v27 = vmul.f32 %v2041_v57, %v648_v19 }
  0xfc   :  { %v635_v25 = vadd.f32 %v2039_v28, %v634_v11 }
  0xfd   :  { %v2043_v36 = vpop.eup %2042  ;;  %v650_v6 = vadd.f32 %v2041_v57, %v649_v27 }
  0xfe   :  { %v639_v30 = vsel %vm638_vm4, %v2039_v28, %v635_v25  ;;  %v667_v18 = vmul.f32 %v2043_v36, %v665_v45  ;;  %v2045_v39 = vpop.eup %2044  ;;  %vm672_vm8 = vweird.f32 %v2043_v36  ;;  %v675_v28 = vand.u32 2147483647, %v665_v45 }
  0xff   :  { %v644_v12 = vsel %vm641_vm5, %v643_v40, %v639_v30  ;;  %v654_v63 = vsel %vm653_vm6, %v2041_v57, %v650_v6  ;;  %vm673_vm10 = vmor %vm671_vm9, %vm672_vm8 }
 0x100   :  { %v659_v17 = vsel %vm656_vm7, %v658_v24, %v654_v63  ;;  %v682_v19 = vmul.f32 %v2045_v39, %v644_v12  ;;  %v668_v58 = vsub.f32 1.0, %v667_v18  ;;  %vm676_vm11 = vcmp.eq.f32.partialorder %v675_v28, 8.507059e+37 }
 0x101   :  { %v681_v0 = vmul.f32 0.0, %v659_v17 }
 0x102   :  { %v669_v11 = vmul.f32 %v2043_v36, %v668_v58  ;;  %v271_v58 = vadd.f32 %v2786_v29, %v2792_v38 }
 0x103   :  { %v2873_v62 = vadd.f32 %v682_v19, %v681_v0 }
 0x104   :  { %v670_v16 = vadd.f32 %v2043_v36, %v669_v11 }
 0x105   :  { %2046 = vtanh.f32 %v2873_v62 }
 0x106   :  { %v674_v5 = vsel %vm673_vm10, %v2043_v36, %v670_v16 }
 0x107   :  { %v679_v27 = vsel %vm676_vm11, %v678_v23, %v674_v5 }
 0x10b   :  { %v2047_v57 = vpop.eup %2046 }
 0x10c   :  { %v685_v55 = vmul.f32 %v2047_v57, %v679_v27 }
 0x10e   :  { %v686_v25 = vpack.c.bf16 %v685_v55, %v685_v55 }
 0x110   :  { %695 = vmatmul.bf16.vlgmr.msra.gmra.mxu0 %v686_v25  ;;  %708 = vmatmul.bf16.vlgmr.msra.gmra.mxu1 %v686_v25 }
 0x111   :  { %721 = vmatmul.bf16.vlgmr.msra.gmra.mxu2 %v686_v25  ;;  %734 = vmatmul.bf16.vlgmr.msra.gmra.mxu3 %v686_v25 }
 0x112   :  { %927 = vmatpush.bf16.msra.mxu0 %v2430_v37  ;;  %940 = vmatpush.bf16.msra.mxu1 %v2441_v41 }
 0x113   :  { %953 = vmatpush.bf16.msra.mxu2 %v2458_v47  ;;  %966 = vmatpush.bf16.msra.mxu3 %v2461_v48 }
 0x116   :  { %928 = vmatpush.bf16.msra.mxu0 %v2463_v49  ;;  %941 = vmatpush.bf16.msra.mxu1 %v2475_v53 }
 0x117   :  { %954 = vmatpush.bf16.msra.mxu2 %v2493_v59  ;;  %967 = vmatpush.bf16.msra.mxu3 %v2497_v60 }
 0x11a   :  { %929 = vmatpush.bf16.msra.mxu0 %v2499_v61  ;;  %942 = vmatpush.bf16.msra.mxu1 %v2511_v1 }
 0x11b   :  { %955 = vmatpush.bf16.msra.mxu2 %v2529_v7  ;;  %968 = vmatpush.bf16.msra.mxu3 %v2533_v8 }
 0x11e   :  { %930 = vmatpush.bf16.msra.mxu0 %v2535_v9  ;;  %943 = vmatpush.bf16.msra.mxu1 %v2547_v13 }
 0x11f   :  { %956 = vmatpush.bf16.msra.mxu2 %v2568_v20  ;;  %969 = vmatpush.bf16.msra.mxu3 %v2572_v21 }
 0x122   :  { %931 = vmatpush.bf16.msra.mxu0 %v2574_v22  ;;  %944 = vmatpush.bf16.msra.mxu1 %v2586_v26 }
 0x123   :  { %957 = vmatpush.bf16.msra.mxu2 %v2604_v32  ;;  %970 = vmatpush.bf16.msra.mxu3 %v2608_v33 }
 0x126   :  { %932 = vmatpush.bf16.msra.mxu0 %v2610_v34  ;;  %945 = vmatpush.bf16.msra.mxu1 %v2613_v35 }
 0x127   :  { %958 = vmatpush.bf16.msra.mxu2 %v2649_v52  ;;  %971 = vmatpush.bf16.msra.mxu3 %v2633_v43 }
 0x12a   :  { %933 = vmatpush.bf16.msra.mxu0 %v2635_v44  ;;  %946 = vmatpush.bf16.msra.mxu1 %v2647_v51 }
 0x12b   :  { %959 = vmatpush.bf16.msra.mxu2 %v2682_v4  ;;  %972 = vmatpush.bf16.msra.mxu3 %v2678_v2 }
 0x12e   :  { %934 = vmatpush.bf16.msra.mxu0 %v2680_v3  ;;  %947 = vmatpush.bf16.msra.mxu1 %v2691_v10 }
 0x12f   :  { %960 = vmatpush.bf16.msra.mxu2 %v2700_v14  ;;  %973 = vmatpush.bf16.msra.mxu3 %v2704_v15 }
 0x18d   :  { %v696_v0 = vpop.f32.mrf.mxu0  ;;  %v709_v45 = vpop.f32.mrf.mxu1 }
 0x18e   :  { %v739_v36 = vadd.f32 %v696_v0, %v271_v58  ;;  %v740_v40 = vadd.f32 %v709_v45, %v2788_v31 }
 0x190   :  { %v1900_v6 = vmul.f32 -1.442695, %v739_v36  ;;  %v1901_v24 = vmul.f32 -1.442695, %v740_v40 }
 0x192   :  { %2048 = vpow2.f32 %v1900_v6 }
 0x193   :  { %2050 = vpow2.f32 %v1901_v24 }
 0x194   :  { %v722_v30 = vpop.f32.mrf.mxu2  ;;  %v735_v18 = vpop.f32.mrf.mxu3 }
 0x195   :  { %v742_v39 = vadd.f32 %v735_v18, %v2800_v50  ;;  %v698_v12 = vpop.f32.mrf.mxu0  ;;  %v711_v63 = vpop.f32.mrf.mxu1  ;;  %v741_v23 = vadd.f32 %v722_v30, %v2797_v42 }
 0x197   :  { %v1902_v17 = vmul.f32 -1.442695, %v742_v39 }
 0x198   :  { %v2049_v19 = vpop.eup %2048 }
 0x199   :  { %v2051_v11 = vpop.eup %2050  ;;  %v749_v16 = vadd.f32 1.0, %v2049_v19  ;;  %2052 = vpow2.f32 %v1902_v17 }
 0x19a   :  { %v750_v29 = vadd.f32 1.0, %v2051_v11 }
 0x19b   :  { %2054 = vrcp.f32 %v749_v16  ;;  %v762_v58 = vand.u32 2147483648, %v749_v16  ;;  %v760_v36 = vand.u32 2147483647, %v749_v16  ;;  %vm756_vm14 = vweird.f32 %v749_v16 }
 0x19c   :  { %2056 = vrcp.f32 %v750_v29  ;;  %v724_v38 = vpop.f32.mrf.mxu2  ;;  %v737_v31 = vpop.f32.mrf.mxu3  ;;  %v777_v0 = vand.u32 2147483648, %v750_v29  ;;  %v775_v6 = vand.u32 2147483647, %v750_v29  ;;  %vm771_vm15 = vweird.f32 %v750_v29 }
 0x19d   :  { %v763_v42 = vor.u32 1.1754944e-38, %v762_v58  ;;  %vm761_vm2 = vcmp.eq.f32.partialorder %v760_v36, 8.507059e+37 }
 0x19e   :  { %v778_v12 = vor.u32 1.1754944e-38, %v777_v0  ;;  %vm776_vm3 = vcmp.eq.f32.partialorder %v775_v6, 8.507059e+37 }
 0x19f   :  { %v2053_v46 = vpop.eup %2052 }
 0x1a0   :  { %v785_v28 = vadd.f32 1.0, %v2053_v46 }
 0x1a1   :  { %v2055_v5 = vpop.eup %2054 }
 0x1a2   :  { %v2057_v57 = vpop.eup %2056  ;;  %v752_v27 = vmul.f32 %v2055_v5, %v749_v16  ;;  %2058 = vrcp.f32 %v785_v28  ;;  %vm757_vm12 = vweird.f32 %v2055_v5  ;;  %vm791_vm5 = vweird.f32 %v785_v28 }
 0x1a3   :  { %v767_v50 = vmul.f32 %v2057_v57, %v750_v29  ;;  %2060 = vtanh.f32 %v741_v23  ;;  %vm772_vm13 = vweird.f32 %v2057_v57  ;;  %vm758_vm0 = vmor %vm756_vm14, %vm757_vm12 }
 0x1a4   :  { %v753_v55 = vsub.f32 1.0, %v752_v27  ;;  %vm773_vm1 = vmor %vm771_vm15, %vm772_vm13 }
 0x1a5   :  { %v768_v25 = vsub.f32 1.0, %v767_v50  ;;  %v797_v50 = vand.u32 2147483648, %v785_v28 }
 0x1a6   :  { %v754_v45 = vmul.f32 %v2055_v5, %v753_v55 }
 0x1a7   :  { %v769_v40 = vmul.f32 %v2057_v57, %v768_v25  ;;  %v798_v25 = vor.u32 1.1754944e-38, %v797_v50 }
 0x1a8   :  { %v2059_v24 = vpop.eup %2058  ;;  %v755_v18 = vadd.f32 %v2055_v5, %v754_v45 }
 0x1a9   :  { %v770_v30 = vadd.f32 %v2057_v57, %v769_v40  ;;  %v787_v39 = vmul.f32 %v2059_v24, %v785_v28  ;;  %v2061_v17 = vpop.eup %2060  ;;  %vm792_vm4 = vweird.f32 %v2059_v24 }
 0x1aa   :  { %v759_v63 = vsel %vm758_vm0, %v2055_v5, %v755_v18  ;;  %v795_v5 = vand.u32 2147483647, %v785_v28  ;;  %vm793_vm6 = vmor %vm791_vm5, %vm792_vm4 }
 0x1ab   :  { %v764_v19 = vsel %vm761_vm2, %v763_v42, %v759_v63  ;;  %v774_v11 = vsel %vm773_vm1, %v2057_v57, %v770_v30  ;;  %v788_v38 = vsub.f32 1.0, %v787_v39  ;;  %v3149_v30 = vld [vmem:[#allocation6_spill] sm:$0xff] }
 0x1ac   :  { %v779_v31 = vsel %vm776_vm3, %v778_v12, %v774_v11  ;;  %v802_v46 = vmul.f32 %v2061_v17, %v764_v19  ;;  %vm796_vm7 = vcmp.eq.f32.partialorder %v795_v5, 8.507059e+37 }
 0x1ad   :  { %v801_v23 = vmul.f32 %v779_v31, %v2873_v62  ;;  %v789_v27 = vmul.f32 %v2059_v24, %v788_v38 }
 0x1af   :  { %v2914_v16 = vadd.f32 %v802_v46, %v801_v23  ;;  %v790_v29 = vadd.f32 %v2059_v24, %v789_v27 }
 0x1b1   :  { %2062 = vtanh.f32 %v2914_v16  ;;  %v794_v55 = vsel %vm793_vm6, %v2059_v24, %v790_v29  ;;  %v3150_v29 = vld [vmem:[#allocation5_spill] sm:$0xff] }
 0x1b2   :  { %v799_v58 = vsel %vm796_vm7, %v798_v25, %v794_v55 }
 0x1b7   :  { %v2063_v57 = vpop.eup %2062 }
 0x1b8   :  { %v805_v0 = vmul.f32 %v2063_v57, %v799_v58 }
 0x1ba   :  { %v806_v45 = vpack.c.bf16 %v805_v0, %v805_v0 }
 0x1bc   :  { %815 = vmatmul.bf16.vlgmr.msrb.gmra.mxu0 %v806_v45  ;;  %828 = vmatmul.bf16.vlgmr.msrb.gmra.mxu1 %v806_v45 }
 0x1bd   :  { %841 = vmatmul.bf16.vlgmr.msrb.gmra.mxu2 %v806_v45  ;;  %854 = vmatmul.bf16.vlgmr.msrb.gmra.mxu3 %v806_v45 }
 0x1be   :  { %1047 = vmatpush.bf16.msrb.mxu0 %v2430_v37  ;;  %1060 = vmatpush.bf16.msrb.mxu1 %v2441_v41 }
 0x1bf   :  { %1073 = vmatpush.bf16.msrb.mxu2 %v2458_v47  ;;  %1086 = vmatpush.bf16.msrb.mxu3 %v2461_v48 }
 0x1c2   :  { %1048 = vmatpush.bf16.msrb.mxu0 %v2463_v49  ;;  %1061 = vmatpush.bf16.msrb.mxu1 %v2475_v53 }
 0x1c3   :  { %1074 = vmatpush.bf16.msrb.mxu2 %v2493_v59  ;;  %1087 = vmatpush.bf16.msrb.mxu3 %v2497_v60 }
 0x1c6   :  { %1049 = vmatpush.bf16.msrb.mxu0 %v2499_v61  ;;  %1062 = vmatpush.bf16.msrb.mxu1 %v2511_v1 }
 0x1c7   :  { %1075 = vmatpush.bf16.msrb.mxu2 %v2529_v7  ;;  %1088 = vmatpush.bf16.msrb.mxu3 %v2533_v8 }
 0x1ca   :  { %1050 = vmatpush.bf16.msrb.mxu0 %v2535_v9  ;;  %1063 = vmatpush.bf16.msrb.mxu1 %v2547_v13 }
 0x1cb   :  { %1076 = vmatpush.bf16.msrb.mxu2 %v2568_v20  ;;  %1089 = vmatpush.bf16.msrb.mxu3 %v2572_v21 }
 0x1ce   :  { %1051 = vmatpush.bf16.msrb.mxu0 %v2574_v22  ;;  %1064 = vmatpush.bf16.msrb.mxu1 %v2586_v26 }
 0x1cf   :  { %1077 = vmatpush.bf16.msrb.mxu2 %v2604_v32  ;;  %1090 = vmatpush.bf16.msrb.mxu3 %v2608_v33 }
 0x1d2   :  { %1052 = vmatpush.bf16.msrb.mxu0 %v2610_v34  ;;  %1065 = vmatpush.bf16.msrb.mxu1 %v2613_v35 }
 0x1d3   :  { %1078 = vmatpush.bf16.msrb.mxu2 %v2649_v52  ;;  %1091 = vmatpush.bf16.msrb.mxu3 %v2633_v43 }
 0x1d6   :  { %1053 = vmatpush.bf16.msrb.mxu0 %v2635_v44  ;;  %1066 = vmatpush.bf16.msrb.mxu1 %v2647_v51 }
 0x1d7   :  { %1079 = vmatpush.bf16.msrb.mxu2 %v2682_v4  ;;  %1092 = vmatpush.bf16.msrb.mxu3 %v2678_v2 }
 0x1da   :  { %1054 = vmatpush.bf16.msrb.mxu0 %v2680_v3  ;;  %1067 = vmatpush.bf16.msrb.mxu1 %v2691_v10 }
 0x1db   :  { %1080 = vmatpush.bf16.msrb.mxu2 %v2700_v14  ;;  %1093 = vmatpush.bf16.msrb.mxu3 %v2704_v15 }
 0x239   :  { %v816_v62 = vpop.f32.mrf.mxu0  ;;  %v829_v28 = vpop.f32.mrf.mxu1 }
 0x23a   :  { %v859_v36 = vadd.f32 %v816_v62, %v2803_v54  ;;  %v860_v40 = vadd.f32 %v829_v28, %v2805_v56 }
 0x23c   :  { %v1903_v6 = vmul.f32 -1.442695, %v859_v36  ;;  %v1904_v24 = vmul.f32 -1.442695, %v860_v40 }
 0x23e   :  { %2064 = vpow2.f32 %v1903_v6 }
 0x23f   :  { %2066 = vpow2.f32 %v1904_v24 }
 0x240   :  { %v842_v18 = vpop.f32.mrf.mxu2  ;;  %v855_v42 = vpop.f32.mrf.mxu3 }
 0x241   :  { %v862_v39 = vadd.f32 %v855_v42, %v3149_v30  ;;  %v818_v12 = vpop.f32.mrf.mxu0  ;;  %v831_v63 = vpop.f32.mrf.mxu1  ;;  %v861_v50 = vadd.f32 %v842_v18, %v3150_v29 }
 0x243   :  { %v1905_v17 = vmul.f32 -1.442695, %v862_v39 }
 0x244   :  { %v2065_v19 = vpop.eup %2064 }
 0x245   :  { %v2067_v11 = vpop.eup %2066  ;;  %v869_v38 = vadd.f32 1.0, %v2065_v19  ;;  %2068 = vpow2.f32 %v1905_v17 }
 0x246   :  { %v870_v31 = vadd.f32 1.0, %v2067_v11 }
 0x247   :  { %2070 = vrcp.f32 %v869_v38  ;;  %v882_v0 = vand.u32 2147483648, %v869_v38  ;;  %v880_v28 = vand.u32 2147483647, %v869_v38  ;;  %vm876_vm10 = vweird.f32 %v869_v38 }
 0x248   :  { %2072 = vrcp.f32 %v870_v31  ;;  %v844_v54 = vpop.f32.mrf.mxu2  ;;  %v857_v56 = vpop.f32.mrf.mxu3  ;;  %v897_v45 = vand.u32 2147483648, %v870_v31  ;;  %v895_v40 = vand.u32 2147483647, %v870_v31  ;;  %vm891_vm11 = vweird.f32 %v870_v31 }
 0x249   :  { %v883_v18 = vor.u32 1.1754944e-38, %v882_v0  ;;  %vm881_vm14 = vcmp.eq.f32.partialorder %v880_v28, 8.507059e+37  ;;  %v3152_v28 = vld [vmem:[#allocation8_spill] sm:$0xff] }
 0x24a   :  { %v898_v39 = vor.u32 1.1754944e-38, %v897_v45  ;;  %vm896_vm15 = vcmp.eq.f32.partialorder %v895_v40, 8.507059e+37  ;;  %v3151_v45 = vld [vmem:[#allocation7_spill] sm:$0xff] }
 0x24b   :  { %v2069_v46 = vpop.eup %2068 }
 0x24c   :  { %v905_v23 = vadd.f32 1.0, %v2069_v46 }
 0x24d   :  { %v2071_v27 = vpop.eup %2070 }
 0x24e   :  { %v2073_v5 = vpop.eup %2072  ;;  %v872_v55 = vmul.f32 %v2071_v27, %v869_v38  ;;  %2074 = vrcp.f32 %v905_v23  ;;  %vm877_vm8 = vweird.f32 %v2071_v27  ;;  %vm911_vm1 = vweird.f32 %v905_v23 }
 0x24f   :  { %v887_v25 = vmul.f32 %v2073_v5, %v870_v31  ;;  %2076 = vtanh.f32 %v861_v50  ;;  %vm892_vm9 = vweird.f32 %v2073_v5  ;;  %vm878_vm12 = vmor %vm876_vm10, %vm877_vm8  ;;  %v917_v50 = vand.u32 2147483648, %v905_v23 }
 0x250   :  { %v873_v57 = vsub.f32 1.0, %v872_v55  ;;  %vm893_vm13 = vmor %vm891_vm11, %vm892_vm9 }
 0x251   :  { %v888_v58 = vsub.f32 1.0, %v887_v25  ;;  %v918_v25 = vor.u32 1.1754944e-38, %v917_v50 }
 0x252   :  { %v874_v62 = vmul.f32 %v2071_v27, %v873_v57 }
 0x253   :  { %v889_v36 = vmul.f32 %v2073_v5, %v888_v58 }
 0x254   :  { %v2075_v6 = vpop.eup %2074  ;;  %v875_v24 = vadd.f32 %v2071_v27, %v874_v62 }
 0x255   :  { %v890_v42 = vadd.f32 %v2073_v5, %v889_v36  ;;  %v907_v30 = vmul.f32 %v2075_v6, %v905_v23  ;;  %v2077_v63 = vpop.eup %2076  ;;  %vm912_vm0 = vweird.f32 %v2075_v6 }
 0x256   :  { %v879_v12 = vsel %vm878_vm12, %v2071_v27, %v875_v24  ;;  %v915_v27 = vand.u32 2147483647, %v905_v23  ;;  %vm913_vm2 = vmor %vm911_vm1, %vm912_vm0 }
 0x257   :  { %v884_v17 = vsel %vm881_vm14, %v883_v18, %v879_v12  ;;  %v894_v19 = vsel %vm893_vm13, %v2073_v5, %v890_v42  ;;  %v908_v11 = vsub.f32 1.0, %v907_v30  ;;  %v3153_v42 = vld [vmem:[#allocation10_spill] sm:$0xff] }
 0x258   :  { %v899_v54 = vsel %vm896_vm15, %v898_v39, %v894_v19  ;;  %v922_v56 = vmul.f32 %v2077_v63, %v884_v17  ;;  %vm916_vm3 = vcmp.eq.f32.partialorder %v915_v27, 8.507059e+37  ;;  %v3154_v27 = vld [vmem:[#allocation9_spill] sm:$0xff] }
 0x259   :  { %v921_v46 = vmul.f32 %v899_v54, %v2914_v16  ;;  %v909_v29 = vmul.f32 %v2075_v6, %v908_v11 }
 0x25b   :  { %v2954_v38 = vadd.f32 %v922_v56, %v921_v46  ;;  %v910_v31 = vadd.f32 %v2075_v6, %v909_v29 }
 0x25d   :  { %2078 = vtanh.f32 %v2954_v38  ;;  %v914_v55 = vsel %vm913_vm2, %v2075_v6, %v910_v31 }
 0x25e   :  { %v919_v57 = vsel %vm916_vm3, %v918_v25, %v914_v55 }
 0x263   :  { %v2079_v5 = vpop.eup %2078 }
 0x264   :  { %v925_v58 = vmul.f32 %v2079_v5, %v919_v57 }
 0x266   :  { %v926_v0 = vpack.c.bf16 %v925_v58, %v925_v58 }
 0x268   :  { %935 = vmatmul.bf16.vlgmr.msra.gmra.mxu0 %v926_v0  ;;  %948 = vmatmul.bf16.vlgmr.msra.gmra.mxu1 %v926_v0 }
 0x269   :  { %961 = vmatmul.bf16.vlgmr.msra.gmra.mxu2 %v926_v0  ;;  %974 = vmatmul.bf16.vlgmr.msra.gmra.mxu3 %v926_v0 }
 0x26a   :  { %1167 = vmatpush.bf16.msra.mxu0 %v2430_v37  ;;  %1180 = vmatpush.bf16.msra.mxu1 %v2441_v41 }
 0x26b   :  { %1193 = vmatpush.bf16.msra.mxu2 %v2458_v47  ;;  %1206 = vmatpush.bf16.msra.mxu3 %v2461_v48 }
 0x26e   :  { %1168 = vmatpush.bf16.msra.mxu0 %v2463_v49  ;;  %1181 = vmatpush.bf16.msra.mxu1 %v2475_v53 }
 0x26f   :  { %1194 = vmatpush.bf16.msra.mxu2 %v2493_v59  ;;  %1207 = vmatpush.bf16.msra.mxu3 %v2497_v60 }
 0x272   :  { %1169 = vmatpush.bf16.msra.mxu0 %v2499_v61  ;;  %1182 = vmatpush.bf16.msra.mxu1 %v2511_v1 }
 0x273   :  { %1195 = vmatpush.bf16.msra.mxu2 %v2529_v7  ;;  %1208 = vmatpush.bf16.msra.mxu3 %v2533_v8 }
 0x276   :  { %1170 = vmatpush.bf16.msra.mxu0 %v2535_v9  ;;  %1183 = vmatpush.bf16.msra.mxu1 %v2547_v13 }
 0x277   :  { %1196 = vmatpush.bf16.msra.mxu2 %v2568_v20  ;;  %1209 = vmatpush.bf16.msra.mxu3 %v2572_v21 }
 0x27a   :  { %1171 = vmatpush.bf16.msra.mxu0 %v2574_v22  ;;  %1184 = vmatpush.bf16.msra.mxu1 %v2586_v26 }
 0x27b   :  { %1197 = vmatpush.bf16.msra.mxu2 %v2604_v32  ;;  %1210 = vmatpush.bf16.msra.mxu3 %v2608_v33 }
 0x27e   :  { %1172 = vmatpush.bf16.msra.mxu0 %v2610_v34  ;;  %1185 = vmatpush.bf16.msra.mxu1 %v2613_v35 }
 0x27f   :  { %1198 = vmatpush.bf16.msra.mxu2 %v2649_v52  ;;  %1211 = vmatpush.bf16.msra.mxu3 %v2633_v43 }
 0x282   :  { %1173 = vmatpush.bf16.msra.mxu0 %v2635_v44  ;;  %1186 = vmatpush.bf16.msra.mxu1 %v2647_v51 }
 0x283   :  { %1199 = vmatpush.bf16.msra.mxu2 %v2682_v4  ;;  %1212 = vmatpush.bf16.msra.mxu3 %v2678_v2 }
 0x286   :  { %1174 = vmatpush.bf16.msra.mxu0 %v2680_v3  ;;  %1187 = vmatpush.bf16.msra.mxu1 %v2691_v10 }
 0x287   :  { %1200 = vmatpush.bf16.msra.mxu2 %v2700_v14  ;;  %1213 = vmatpush.bf16.msra.mxu3 %v2704_v15 }
 0x2e5   :  { %v936_v16 = vpop.f32.mrf.mxu0  ;;  %v949_v23 = vpop.f32.mrf.mxu1 }
 0x2e6   :  { %v979_v62 = vadd.f32 %v936_v16, %v3151_v45  ;;  %v980_v36 = vadd.f32 %v949_v23, %v3152_v28 }
 0x2e8   :  { %v1906_v40 = vmul.f32 -1.442695, %v979_v62  ;;  %v1907_v6 = vmul.f32 -1.442695, %v980_v36 }
 0x2ea   :  { %2080 = vpow2.f32 %v1906_v40 }
 0x2eb   :  { %2082 = vpow2.f32 %v1907_v6 }
 0x2ec   :  { %v962_v24 = vpop.f32.mrf.mxu2  ;;  %v975_v18 = vpop.f32.mrf.mxu3 }
 0x2ed   :  { %v982_v30 = vadd.f32 %v975_v18, %v3153_v42  ;;  %v938_v39 = vpop.f32.mrf.mxu0  ;;  %v951_v12 = vpop.f32.mrf.mxu1  ;;  %v981_v55 = vadd.f32 %v962_v24, %v3154_v27 }
 0x2ef   :  { %v1908_v63 = vmul.f32 -1.442695, %v982_v30 }
 0x2f0   :  { %v2081_v17 = vpop.eup %2080 }
 0x2f1   :  { %v2083_v19 = vpop.eup %2082  ;;  %v989_v11 = vadd.f32 1.0, %v2081_v17  ;;  %2084 = vpow2.f32 %v1908_v63 }
 0x2f2   :  { %v990_v54 = vadd.f32 1.0, %v2083_v19 }
 0x2f3   :  { %2086 = vrcp.f32 %v989_v11  ;;  %v1002_v16 = vand.u32 2147483648, %v989_v11  ;;  %v1000_v62 = vand.u32 2147483647, %v989_v11  ;;  %vm996_vm6 = vweird.f32 %v989_v11 }
 0x2f4   :  { %2088 = vrcp.f32 %v990_v54  ;;  %v964_v56 = vpop.f32.mrf.mxu2  ;;  %v977_v46 = vpop.f32.mrf.mxu3  ;;  %v1017_v23 = vand.u32 2147483648, %v990_v54  ;;  %v1015_v36 = vand.u32 2147483647, %v990_v54  ;;  %vm1011_vm7 = vweird.f32 %v990_v54 }
 0x2f5   :  { %v1003_v24 = vor.u32 1.1754944e-38, %v1002_v16  ;;  %vm1001_vm10 = vcmp.eq.f32.partialorder %v1000_v62, 8.507059e+37  ;;  %v3156_v62 = vld [vmem:[#allocation12_spill] sm:$0xff] }
 0x2f6   :  { %v1018_v30 = vor.u32 1.1754944e-38, %v1017_v23  ;;  %vm1016_vm11 = vcmp.eq.f32.partialorder %v1015_v36, 8.507059e+37  ;;  %v3155_v23 = vld [vmem:[#allocation11_spill] sm:$0xff] }
 0x2f7   :  { %v2085_v29 = vpop.eup %2084 }
 0x2f8   :  { %v1025_v31 = vadd.f32 1.0, %v2085_v29 }
 0x2f9   :  { %v2087_v50 = vpop.eup %2086 }
 0x2fa   :  { %v2089_v25 = vpop.eup %2088  ;;  %v992_v5 = vmul.f32 %v2087_v50, %v989_v11  ;;  %2090 = vrcp.f32 %v1025_v31  ;;  %vm997_vm4 = vweird.f32 %v2087_v50  ;;  %vm1031_vm13 = vweird.f32 %v1025_v31 }
 0x2fb   :  { %v1007_v57 = vmul.f32 %v2089_v25, %v990_v54  ;;  %2092 = vtanh.f32 %v981_v55  ;;  %vm1012_vm5 = vweird.f32 %v2089_v25  ;;  %vm998_vm8 = vmor %vm996_vm6, %vm997_vm4  ;;  %v1037_v55 = vand.u32 2147483648, %v1025_v31 }
 0x2fc   :  { %v993_v58 = vsub.f32 1.0, %v992_v5  ;;  %vm1013_vm9 = vmor %vm1011_vm7, %vm1012_vm5 }
 0x2fd   :  { %v1008_v0 = vsub.f32 1.0, %v1007_v57  ;;  %v1038_v57 = vor.u32 1.1754944e-38, %v1037_v55 }
 0x2fe   :  { %v994_v45 = vmul.f32 %v2087_v50, %v993_v58 }
 0x2ff   :  { %v1009_v28 = vmul.f32 %v2089_v25, %v1008_v0 }
 0x300   :  { %v2091_v40 = vpop.eup %2090  ;;  %v995_v6 = vadd.f32 %v2087_v50, %v994_v45 }
 0x301   :  { %v1010_v18 = vadd.f32 %v2089_v25, %v1009_v28  ;;  %v1027_v42 = vmul.f32 %v2091_v40, %v1025_v31  ;;  %v2093_v12 = vpop.eup %2092  ;;  %vm1032_vm12 = vweird.f32 %v2091_v40 }
 0x302   :  { %v999_v39 = vsel %vm998_vm8, %v2087_v50, %v995_v6  ;;  %v1035_v50 = vand.u32 2147483647, %v1025_v31  ;;  %vm1033_vm14 = vmor %vm1031_vm13, %vm1032_vm12 }
 0x303   :  { %v1004_v63 = vsel %vm1001_vm10, %v1003_v24, %v999_v39  ;;  %v1014_v17 = vsel %vm1013_vm9, %v2089_v25, %v1010_v18  ;;  %v1028_v19 = vsub.f32 1.0, %v1027_v42  ;;  %v3157_v18 = vld [vmem:[#allocation14_spill] sm:$0xff] }
 0x304   :  { %v1019_v56 = vsel %vm1016_vm11, %v1018_v30, %v1014_v17  ;;  %v1042_v46 = vmul.f32 %v2093_v12, %v1004_v63  ;;  %vm1036_vm15 = vcmp.eq.f32.partialorder %v1035_v50, 8.507059e+37  ;;  %v3158_v50 = vld [vmem:[#allocation13_spill] sm:$0xff] }
 0x305   :  { %v1041_v29 = vmul.f32 %v1019_v56, %v2954_v38  ;;  %v1029_v27 = vmul.f32 %v2091_v40, %v1028_v19 }
 0x307   :  { %v2994_v11 = vadd.f32 %v1042_v46, %v1041_v29  ;;  %v1030_v54 = vadd.f32 %v2091_v40, %v1029_v27 }
 0x309   :  { %2094 = vtanh.f32 %v2994_v11  ;;  %v1034_v5 = vsel %vm1033_vm14, %v2091_v40, %v1030_v54 }
 0x30a   :  { %v1039_v58 = vsel %vm1036_vm15, %v1038_v57, %v1034_v5 }
 0x30f   :  { %v2095_v25 = vpop.eup %2094 }
 0x310   :  { %v1045_v0 = vmul.f32 %v2095_v25, %v1039_v58 }
 0x312   :  { %v1046_v16 = vpack.c.bf16 %v1045_v0, %v1045_v0 }
 0x314   :  { %1055 = vmatmul.bf16.vlgmr.msrb.gmra.mxu0 %v1046_v16  ;;  %1068 = vmatmul.bf16.vlgmr.msrb.gmra.mxu1 %v1046_v16 }
 0x315   :  { %1081 = vmatmul.bf16.vlgmr.msrb.gmra.mxu2 %v1046_v16  ;;  %1094 = vmatmul.bf16.vlgmr.msrb.gmra.mxu3 %v1046_v16 }
 0x316   :  { %1287 = vmatpush.bf16.msrb.mxu0 %v2430_v37  ;;  %1300 = vmatpush.bf16.msrb.mxu1 %v2441_v41 }
 0x317   :  { %1313 = vmatpush.bf16.msrb.mxu2 %v2458_v47  ;;  %1326 = vmatpush.bf16.msrb.mxu3 %v2461_v48 }
 0x31a   :  { %1288 = vmatpush.bf16.msrb.mxu0 %v2463_v49  ;;  %1301 = vmatpush.bf16.msrb.mxu1 %v2475_v53 }
 0x31b   :  { %1314 = vmatpush.bf16.msrb.mxu2 %v2493_v59  ;;  %1327 = vmatpush.bf16.msrb.mxu3 %v2497_v60 }
 0x31e   :  { %1289 = vmatpush.bf16.msrb.mxu0 %v2499_v61  ;;  %1302 = vmatpush.bf16.msrb.mxu1 %v2511_v1 }
 0x31f   :  { %1315 = vmatpush.bf16.msrb.mxu2 %v2529_v7  ;;  %1328 = vmatpush.bf16.msrb.mxu3 %v2533_v8 }
 0x322   :  { %1290 = vmatpush.bf16.msrb.mxu0 %v2535_v9  ;;  %1303 = vmatpush.bf16.msrb.mxu1 %v2547_v13 }
 0x323   :  { %1316 = vmatpush.bf16.msrb.mxu2 %v2568_v20  ;;  %1329 = vmatpush.bf16.msrb.mxu3 %v2572_v21 }
 0x326   :  { %1291 = vmatpush.bf16.msrb.mxu0 %v2574_v22  ;;  %1304 = vmatpush.bf16.msrb.mxu1 %v2586_v26 }
 0x327   :  { %1317 = vmatpush.bf16.msrb.mxu2 %v2604_v32  ;;  %1330 = vmatpush.bf16.msrb.mxu3 %v2608_v33 }
 0x32a   :  { %1292 = vmatpush.bf16.msrb.mxu0 %v2610_v34  ;;  %1305 = vmatpush.bf16.msrb.mxu1 %v2613_v35 }
 0x32b   :  { %1318 = vmatpush.bf16.msrb.mxu2 %v2649_v52  ;;  %1331 = vmatpush.bf16.msrb.mxu3 %v2633_v43 }
 0x32e   :  { %1293 = vmatpush.bf16.msrb.mxu0 %v2635_v44  ;;  %1306 = vmatpush.bf16.msrb.mxu1 %v2647_v51 }
 0x32f   :  { %1319 = vmatpush.bf16.msrb.mxu2 %v2682_v4  ;;  %1332 = vmatpush.bf16.msrb.mxu3 %v2678_v2 }
 0x332   :  { %1294 = vmatpush.bf16.msrb.mxu0 %v2680_v3  ;;  %1307 = vmatpush.bf16.msrb.mxu1 %v2691_v10 }
 0x333   :  { %1320 = vmatpush.bf16.msrb.mxu2 %v2700_v14  ;;  %1333 = vmatpush.bf16.msrb.mxu3 %v2704_v15 }
 0x391   :  { %v1056_v38 = vpop.f32.mrf.mxu0  ;;  %v1069_v31 = vpop.f32.mrf.mxu1 }
 0x392   :  { %v1099_v45 = vadd.f32 %v1056_v38, %v3155_v23  ;;  %v1100_v28 = vadd.f32 %v1069_v31, %v3156_v62 }
 0x394   :  { %v1909_v36 = vmul.f32 -1.442695, %v1099_v45  ;;  %v1910_v40 = vmul.f32 -1.442695, %v1100_v28 }
 0x396   :  { %2096 = vpow2.f32 %v1909_v36 }
 0x397   :  { %2098 = vpow2.f32 %v1910_v40 }
 0x398   :  { %v1082_v6 = vpop.f32.mrf.mxu2  ;;  %v1095_v24 = vpop.f32.mrf.mxu3 }
 0x399   :  { %v1102_v42 = vadd.f32 %v1095_v24, %v3157_v18  ;;  %v1058_v30 = vpop.f32.mrf.mxu0  ;;  %v1071_v39 = vpop.f32.mrf.mxu1  ;;  %v1101_v5 = vadd.f32 %v1082_v6, %v3158_v50 }
 0x39b   :  { %v1911_v12 = vmul.f32 -1.442695, %v1102_v42 }
 0x39c   :  { %v2097_v63 = vpop.eup %2096 }
 0x39d   :  { %v2099_v17 = vpop.eup %2098  ;;  %v1109_v19 = vadd.f32 1.0, %v2097_v63  ;;  %2100 = vpow2.f32 %v1911_v12 }
 0x39e   :  { %v1110_v56 = vadd.f32 1.0, %v2099_v17 }
 0x39f   :  { %2102 = vrcp.f32 %v1109_v19  ;;  %v1122_v38 = vand.u32 2147483648, %v1109_v19  ;;  %v1120_v45 = vand.u32 2147483647, %v1109_v19  ;;  %vm1116_vm2 = vweird.f32 %v1109_v19 }
 0x3a0   :  { %2104 = vrcp.f32 %v1110_v56  ;;  %v1084_v46 = vpop.f32.mrf.mxu2  ;;  %v1097_v29 = vpop.f32.mrf.mxu3  ;;  %v1137_v31 = vand.u32 2147483648, %v1110_v56  ;;  %v1135_v28 = vand.u32 2147483647, %v1110_v56  ;;  %vm1131_vm3 = vweird.f32 %v1110_v56 }
 0x3a1   :  { %v1123_v6 = vor.u32 1.1754944e-38, %v1122_v38  ;;  %vm1121_vm6 = vcmp.eq.f32.partialorder %v1120_v45, 8.507059e+37 }
 0x3a2   :  { %v1138_v42 = vor.u32 1.1754944e-38, %v1137_v31  ;;  %vm1136_vm7 = vcmp.eq.f32.partialorder %v1135_v28, 8.507059e+37 }
 0x3a3   :  { %v2101_v27 = vpop.eup %2100 }
 0x3a4   :  { %v1145_v54 = vadd.f32 1.0, %v2101_v27 }
 0x3a5   :  { %v2103_v55 = vpop.eup %2102 }
 0x3a6   :  { %v2105_v57 = vpop.eup %2104  ;;  %v1112_v25 = vmul.f32 %v2103_v55, %v1109_v19  ;;  %2106 = vrcp.f32 %v1145_v54  ;;  %vm1117_vm0 = vweird.f32 %v2103_v55  ;;  %vm1151_vm9 = vweird.f32 %v1145_v54 }
 0x3a7   :  { %v1127_v58 = vmul.f32 %v2105_v57, %v1110_v56  ;;  %2108 = vtanh.f32 %v1101_v5  ;;  %vm1132_vm1 = vweird.f32 %v2105_v57  ;;  %vm1118_vm4 = vmor %vm1116_vm2, %vm1117_vm0  ;;  %v1157_v5 = vand.u32 2147483648, %v1145_v54 }
 0x3a8   :  { %v1113_v0 = vsub.f32 1.0, %v1112_v25  ;;  %vm1133_vm5 = vmor %vm1131_vm3, %vm1132_vm1 }
 0x3a9   :  { %v1128_v16 = vsub.f32 1.0, %v1127_v58  ;;  %v1158_v58 = vor.u32 1.1754944e-38, %v1157_v5 }
 0x3aa   :  { %v1114_v23 = vmul.f32 %v2103_v55, %v1113_v0 }
 0x3ab   :  { %v1129_v62 = vmul.f32 %v2105_v57, %v1128_v16 }
 0x3ac   :  { %v2107_v36 = vpop.eup %2106  ;;  %v1115_v40 = vadd.f32 %v2103_v55, %v1114_v23 }
 0x3ad   :  { %v1130_v24 = vadd.f32 %v2105_v57, %v1129_v62  ;;  %v1147_v18 = vmul.f32 %v2107_v36, %v1145_v54  ;;  %v2109_v39 = vpop.eup %2108  ;;  %vm1152_vm8 = vweird.f32 %v2107_v36 }
 0x3ae   :  { %v1119_v30 = vsel %vm1118_vm4, %v2103_v55, %v1115_v40  ;;  %v1155_v55 = vand.u32 2147483647, %v1145_v54  ;;  %vm1153_vm10 = vmor %vm1151_vm9, %vm1152_vm8 }
 0x3af   :  { %v1124_v12 = vsel %vm1121_vm6, %v1123_v6, %v1119_v30  ;;  %v1134_v63 = vsel %vm1133_vm5, %v2105_v57, %v1130_v24  ;;  %v1148_v17 = vsub.f32 1.0, %v1147_v18 }
 0x3b0   :  { %v1139_v46 = vsel %vm1136_vm7, %v1138_v42, %v1134_v63  ;;  %v1162_v29 = vmul.f32 %v2109_v39, %v1124_v12  ;;  %vm1156_vm11 = vcmp.eq.f32.partialorder %v1155_v55, 8.507059e+37 }
 0x3b1   :  { %v1161_v27 = vmul.f32 %v1139_v46, %v2994_v11  ;;  %v1149_v50 = vmul.f32 %v2107_v36, %v1148_v17 }
 0x3b3   :  { %v3034_v19 = vadd.f32 %v1162_v29, %v1161_v27  ;;  %v1150_v56 = vadd.f32 %v2107_v36, %v1149_v50 }
 0x3b5   :  { %2110 = vtanh.f32 %v3034_v19  ;;  %v1154_v25 = vsel %vm1153_vm10, %v2107_v36, %v1150_v56 }
 0x3b6   :  { %v1159_v0 = vsel %vm1156_vm11, %v1158_v58, %v1154_v25 }
 0x3bb   :  { %v2111_v57 = vpop.eup %2110 }
 0x3bc   :  { %v1165_v16 = vmul.f32 %v2111_v57, %v1159_v0 }
 0x3be   :  { %v1166_v38 = vpack.c.bf16 %v1165_v16, %v1165_v16 }
 0x3c0   :  { %1175 = vmatmul.bf16.vlgmr.msra.gmra.mxu0 %v1166_v38  ;;  %1188 = vmatmul.bf16.vlgmr.msra.gmra.mxu1 %v1166_v38 }
 0x3c1   :  { %1201 = vmatmul.bf16.vlgmr.msra.gmra.mxu2 %v1166_v38  ;;  %1214 = vmatmul.bf16.vlgmr.msra.gmra.mxu3 %v1166_v38 }
 0x3c2   :  { %1407 = vmatpush.bf16.msra.mxu0 %v2430_v37  ;;  %1420 = vmatpush.bf16.msra.mxu1 %v2441_v41 }
 0x3c3   :  { %1433 = vmatpush.bf16.msra.mxu2 %v2458_v47  ;;  %1446 = vmatpush.bf16.msra.mxu3 %v2461_v48  ;;  %v3159_v47 = vld [vmem:[#allocation15_spill] sm:$0xff] }
 0x3c6   :  { %1408 = vmatpush.bf16.msra.mxu0 %v2463_v49  ;;  %1421 = vmatpush.bf16.msra.mxu1 %v2475_v53  ;;  %v3160_v49 = vld [vmem:[#allocation16_spill] sm:$0xff] }
 0x3c7   :  { %1434 = vmatpush.bf16.msra.mxu2 %v2493_v59  ;;  %1447 = vmatpush.bf16.msra.mxu3 %v2497_v60 }
 0x3ca   :  { %1409 = vmatpush.bf16.msra.mxu0 %v2499_v61  ;;  %1422 = vmatpush.bf16.msra.mxu1 %v2511_v1 }
 0x3cb   :  { %1435 = vmatpush.bf16.msra.mxu2 %v2529_v7  ;;  %1448 = vmatpush.bf16.msra.mxu3 %v2533_v8  ;;  %v3161_v7 = vld [vmem:[#allocation18_spill] sm:$0xff] }
 0x3ce   :  { %1410 = vmatpush.bf16.msra.mxu0 %v2535_v9  ;;  %1423 = vmatpush.bf16.msra.mxu1 %v2547_v13 }
 0x3cf   :  { %1436 = vmatpush.bf16.msra.mxu2 %v2568_v20  ;;  %1449 = vmatpush.bf16.msra.mxu3 %v2572_v21 }
 0x3d2   :  { %1411 = vmatpush.bf16.msra.mxu0 %v2574_v22  ;;  %1424 = vmatpush.bf16.msra.mxu1 %v2586_v26 }
 0x3d3   :  { %1437 = vmatpush.bf16.msra.mxu2 %v2604_v32  ;;  %1450 = vmatpush.bf16.msra.mxu3 %v2608_v33 }
 0x3d6   :  { %1412 = vmatpush.bf16.msra.mxu0 %v2610_v34  ;;  %1425 = vmatpush.bf16.msra.mxu1 %v2613_v35 }
 0x3d7   :  { %1438 = vmatpush.bf16.msra.mxu2 %v2649_v52  ;;  %1451 = vmatpush.bf16.msra.mxu3 %v2633_v43 }
 0x3da   :  { %1413 = vmatpush.bf16.msra.mxu0 %v2635_v44  ;;  %1426 = vmatpush.bf16.msra.mxu1 %v2647_v51  ;;  %v3162_v51 = vld [vmem:[#allocation17_spill] sm:$0xff] }
 0x3db   :  { %1439 = vmatpush.bf16.msra.mxu2 %v2682_v4  ;;  %1452 = vmatpush.bf16.msra.mxu3 %v2678_v2 }
 0x3de   :  { %1414 = vmatpush.bf16.msra.mxu0 %v2680_v3  ;;  %1427 = vmatpush.bf16.msra.mxu1 %v2691_v10 }
 0x3df   :  { %1440 = vmatpush.bf16.msra.mxu2 %v2700_v14  ;;  %1453 = vmatpush.bf16.msra.mxu3 %v2704_v15 }
 0x43d   :  { %v1176_v37 = vpop.f32.mrf.mxu0  ;;  %v1189_v41 = vpop.f32.mrf.mxu1 }
 0x43e   :  { %v1219_v48 = vadd.f32 %v1176_v37, %v3159_v47  ;;  %v1220_v53 = vadd.f32 %v1189_v41, %v3160_v49  ;;  %v3163_v37 = vld [vmem:[#allocation19_spill] sm:$0xff]  ;;  %v3164_v47 = vld [vmem:[#allocation20_spill] sm:$0xff] }
 0x440   :  { %v1912_v59 = vmul.f32 -1.442695, %v1219_v48  ;;  %v1913_v60 = vmul.f32 -1.442695, %v1220_v53 }
 0x442   :  { %2112 = vpow2.f32 %v1912_v59 }
 0x443   :  { %2114 = vpow2.f32 %v1913_v60 }
 0x444   :  { %v1202_v61 = vpop.f32.mrf.mxu2  ;;  %v1215_v1 = vpop.f32.mrf.mxu3 }
 0x445   :  { %v1222_v8 = vadd.f32 %v1215_v1, %v3161_v7  ;;  %v1178_v9 = vpop.f32.mrf.mxu0  ;;  %v1191_v13 = vpop.f32.mrf.mxu1  ;;  %v1221_v52 = vadd.f32 %v1202_v61, %v3162_v51  ;;  %v3165_v61 = vld [vmem:[#allocation22_spill] sm:$0xff] }
 0x447   :  { %v1914_v20 = vmul.f32 -1.442695, %v1222_v8 }
 0x448   :  { %v2113_v21 = vpop.eup %2112 }
 0x449   :  { %v2115_v22 = vpop.eup %2114  ;;  %v1229_v26 = vadd.f32 1.0, %v2113_v21  ;;  %2116 = vpow2.f32 %v1914_v20 }
 0x44a   :  { %v1230_v32 = vadd.f32 1.0, %v2115_v22 }
 0x44b   :  { %2118 = vrcp.f32 %v1229_v26  ;;  %v1242_v15 = vand.u32 2147483648, %v1229_v26  ;;  %v1240_v31 = vand.u32 2147483647, %v1229_v26  ;;  %vm1236_vm14 = vweird.f32 %v1229_v26 }
 0x44c   :  { %2120 = vrcp.f32 %v1230_v32  ;;  %v1204_v33 = vpop.f32.mrf.mxu2  ;;  %v1217_v34 = vpop.f32.mrf.mxu3  ;;  %v1257_v11 = vand.u32 2147483648, %v1230_v32  ;;  %v1255_v45 = vand.u32 2147483647, %v1230_v32  ;;  %vm1251_vm15 = vweird.f32 %v1230_v32 }
 0x44d   :  { %v1243_v36 = vor.u32 1.1754944e-38, %v1242_v15  ;;  %vm1241_vm2 = vcmp.eq.f32.partialorder %v1240_v31, 8.507059e+37 }
 0x44e   :  { %v1258_v24 = vor.u32 1.1754944e-38, %v1257_v11  ;;  %vm1256_vm3 = vcmp.eq.f32.partialorder %v1255_v45, 8.507059e+37 }
 0x44f   :  { %v2117_v35 = vpop.eup %2116 }
 0x450   :  { %v1265_v43 = vadd.f32 1.0, %v2117_v35 }
 0x451   :  { %v2119_v44 = vpop.eup %2118 }
 0x452   :  { %v2121_v2 = vpop.eup %2120  ;;  %v1232_v3 = vmul.f32 %v2119_v44, %v1229_v26  ;;  %2122 = vrcp.f32 %v1265_v43  ;;  %vm1237_vm12 = vweird.f32 %v2119_v44  ;;  %v1277_v56 = vand.u32 2147483648, %v1265_v43 }
 0x453   :  { %v1247_v4 = vmul.f32 %v2121_v2, %v1230_v32  ;;  %2124 = vtanh.f32 %v1221_v52  ;;  %vm1252_vm13 = vweird.f32 %v2121_v2  ;;  %vm1238_vm0 = vmor %vm1236_vm14, %vm1237_vm12  ;;  %vm1271_vm5 = vweird.f32 %v1265_v43 }
 0x454   :  { %v1233_v10 = vsub.f32 1.0, %v1232_v3  ;;  %vm1253_vm1 = vmor %vm1251_vm15, %vm1252_vm13  ;;  %v1275_v5 = vand.u32 2147483647, %v1265_v43  ;;  %v1278_v25 = vor.u32 1.1754944e-38, %v1277_v56 }
 0x455   :  { %v1248_v14 = vsub.f32 1.0, %v1247_v4 }
 0x456   :  { %v1234_v54 = vmul.f32 %v2119_v44, %v1233_v10  ;;  %vm1276_vm7 = vcmp.eq.f32.partialorder %v1275_v5, 8.507059e+37 }
 0x457   :  { %v1249_v23 = vmul.f32 %v2121_v2, %v1248_v14 }
 0x458   :  { %v2123_v62 = vpop.eup %2122  ;;  %v1235_v28 = vadd.f32 %v2119_v44, %v1234_v54 }
 0x459   :  { %v1250_v40 = vadd.f32 %v2121_v2, %v1249_v23  ;;  %v1267_v6 = vmul.f32 %v2123_v62, %v1265_v43  ;;  %v2125_v42 = vpop.eup %2124  ;;  %vm1272_vm4 = vweird.f32 %v2123_v62  ;;  %v3166_v43 = vld [vmem:[#allocation21_spill] sm:$0xff] }
 0x45a   :  { %v1239_v18 = vsel %vm1238_vm0, %v2119_v44, %v1235_v28  ;;  %vm1273_vm6 = vmor %vm1271_vm5, %vm1272_vm4 }
 0x45b   :  { %v1244_v30 = vsel %vm1241_vm2, %v1243_v36, %v1239_v18  ;;  %v1254_v39 = vsel %vm1253_vm1, %v2121_v2, %v1250_v40  ;;  %v1268_v12 = vsub.f32 1.0, %v1267_v6 }
 0x45c   :  { %v1259_v63 = vsel %vm1256_vm3, %v1258_v24, %v1254_v39  ;;  %v1282_v17 = vmul.f32 %v2125_v42, %v1244_v30 }
 0x45d   :  { %v1281_v46 = vmul.f32 %v1259_v63, %v3034_v19  ;;  %v1269_v29 = vmul.f32 %v2123_v62, %v1268_v12 }
 0x45f   :  { %v3074_v27 = vadd.f32 %v1282_v17, %v1281_v46  ;;  %v1270_v50 = vadd.f32 %v2123_v62, %v1269_v29 }
 0x461   :  { %2126 = vtanh.f32 %v3074_v27  ;;  %v1274_v55 = vsel %vm1273_vm6, %v2123_v62, %v1270_v50 }
 0x462   :  { %v1279_v57 = vsel %vm1276_vm7, %v1278_v25, %v1274_v55 }
 0x467   :  { %v2127_v58 = vpop.eup %2126 }
 0x468   :  { %v1285_v0 = vmul.f32 %v2127_v58, %v1279_v57 }
 0x46a   :  { %v1286_v16 = vpack.c.bf16 %v1285_v0, %v1285_v0 }
 0x46c   :  { %1295 = vmatmul.bf16.vlgmr.msrb.gmra.mxu0 %v1286_v16  ;;  %1308 = vmatmul.bf16.vlgmr.msrb.gmra.mxu1 %v1286_v16 }
 0x46d   :  { %1321 = vmatmul.bf16.vlgmr.msrb.gmra.mxu2 %v1286_v16  ;;  %1334 = vmatmul.bf16.vlgmr.msrb.gmra.mxu3 %v1286_v16  ;;  %v2027_v16 = vld [vmem:[%s3124_s4 + $0x30] sm:$0xff] }
 0x4e9   :  { %v1296_v19 = vpop.f32.mrf.mxu0  ;;  %v1309_v38 = vpop.f32.mrf.mxu1 }
 0x4ea   :  { %v1339_v41 = vadd.f32 %v1296_v19, %v3163_v37  ;;  %v1340_v48 = vadd.f32 %v1309_v38, %v3164_v47  ;;  %v2026_v19 = vld [vmem:[%s3124_s4 + $0x28] sm:$0xff]  ;;  %v2025_v38 = vld [vmem:[%s3124_s4 + $0x20] sm:$0xff]  ;;  %v2024_v37 = vld [vmem:[%s3124_s4 + $0x18] sm:$0xff] }
 0x4ec   :  { %v1915_v49 = vmul.f32 -1.442695, %v1339_v41  ;;  %v1916_v53 = vmul.f32 -1.442695, %v1340_v48  ;;  %v3167_v48 = vld [vmem:[#allocation23_spill] sm:$0xff] }
 0x4ee   :  { %2128 = vpow2.f32 %v1915_v49 }
 0x4ef   :  { %2130 = vpow2.f32 %v1916_v53  ;;  %v3168_v53 = vld [vmem:[#allocation24_spill] sm:$0xff] }
 0x4f0   :  { %v1322_v59 = vpop.f32.mrf.mxu2  ;;  %v1335_v60 = vpop.f32.mrf.mxu3 }
 0x4f1   :  { %v1342_v1 = vadd.f32 %v1335_v60, %v3165_v61  ;;  %v1298_v7 = vpop.f32.mrf.mxu0  ;;  %v1311_v8 = vpop.f32.mrf.mxu1  ;;  %v1341_v44 = vadd.f32 %v1322_v59, %v3166_v43 }
 0x4f2   :  { %v2022_v7 = vld [vmem:[%s3124_s4 + $0x8] sm:$0xff] }
 0x4f3   :  { %v1917_v9 = vmul.f32 -1.442695, %v1342_v1  ;;  %v2023_v1 = vld [vmem:[%s3124_s4 + $0x10] sm:$0xff] }
 0x4f4   :  { %v2129_v13 = vpop.eup %2128 }
 0x4f5   :  { %v2131_v20 = vpop.eup %2130  ;;  %v1349_v21 = vadd.f32 1.0, %v2129_v13  ;;  %2132 = vpow2.f32 %v1917_v9  ;;  %v3169_v13 = vld [vmem:[#allocation26_spill] sm:$0xff] }
 0x4f6   :  { %v1350_v22 = vadd.f32 1.0, %v2131_v20 }
 0x4f7   :  { %2134 = vrcp.f32 %v1349_v21  ;;  %v1362_v10 = vand.u32 2147483648, %v1349_v21  ;;  %v1360_v11 = vand.u32 2147483647, %v1349_v21  ;;  %vm1356_vm10 = vweird.f32 %v1349_v21 }
 0x4f8   :  { %2136 = vrcp.f32 %v1350_v22  ;;  %v1324_v26 = vpop.f32.mrf.mxu2  ;;  %v1337_v32 = vpop.f32.mrf.mxu3  ;;  %v1377_v14 = vand.u32 2147483648, %v1350_v22  ;;  %v1375_v31 = vand.u32 2147483647, %v1350_v22  ;;  %vm1371_vm11 = vweird.f32 %v1350_v22 }
 0x4f9   :  { %v1363_v62 = vor.u32 1.1754944e-38, %v1362_v10  ;;  %vm1361_vm14 = vcmp.eq.f32.partialorder %v1360_v11, 8.507059e+37  ;;  %v2021_v26 = vld [vmem:[%s3124_s4] sm:$0xff] }
 0x4fa   :  { %v1378_v40 = vor.u32 1.1754944e-38, %v1377_v14  ;;  %vm1376_vm15 = vcmp.eq.f32.partialorder %v1375_v31, 8.507059e+37 }
 0x4fb   :  { %v2133_v33 = vpop.eup %2132 }
 0x4fc   :  { %v1385_v34 = vadd.f32 1.0, %v2133_v33 }
 0x4fd   :  { %v2135_v35 = vpop.eup %2134 }
 0x4fe   :  { %v2137_v51 = vpop.eup %2136  ;;  %v1352_v52 = vmul.f32 %v2135_v35, %v1349_v21  ;;  %2138 = vrcp.f32 %v1385_v34  ;;  %vm1357_vm8 = vweird.f32 %v2135_v35  ;;  %v1397_v50 = vand.u32 2147483648, %v1385_v34 }
 0x4ff   :  { %v1367_v2 = vmul.f32 %v2137_v51, %v1350_v22  ;;  %2140 = vtanh.f32 %v1341_v44  ;;  %vm1372_vm9 = vweird.f32 %v2137_v51  ;;  %vm1358_vm12 = vmor %vm1356_vm10, %vm1357_vm8  ;;  %vm1391_vm1 = vweird.f32 %v1385_v34 }
 0x500   :  { %v1353_v3 = vsub.f32 1.0, %v1352_v52  ;;  %vm1373_vm13 = vmor %vm1371_vm11, %vm1372_vm9  ;;  %v1395_v56 = vand.u32 2147483647, %v1385_v34  ;;  %v1398_v55 = vor.u32 1.1754944e-38, %v1397_v50 }
 0x501   :  { %v1368_v4 = vsub.f32 1.0, %v1367_v2 }
 0x502   :  { %v1354_v15 = vmul.f32 %v2135_v35, %v1353_v3  ;;  %vm1396_vm3 = vcmp.eq.f32.partialorder %v1395_v56, 8.507059e+37 }
 0x503   :  { %v1369_v54 = vmul.f32 %v2137_v51, %v1368_v4  ;;  %v3170_v4 = vld [vmem:[#allocation25_spill] sm:$0xff] }
 0x504   :  { %v2139_v23 = vpop.eup %2138  ;;  %v1355_v45 = vadd.f32 %v2135_v35, %v1354_v15 }
 0x505   :  { %v1370_v28 = vadd.f32 %v2137_v51, %v1369_v54  ;;  %v1387_v36 = vmul.f32 %v2139_v23, %v1385_v34  ;;  %v2141_v24 = vpop.eup %2140  ;;  %vm1392_vm0 = vweird.f32 %v2139_v23 }
 0x506   :  { %v1359_v6 = vsel %vm1358_vm12, %v2135_v35, %v1355_v45  ;;  %vm1393_vm2 = vmor %vm1391_vm1, %vm1392_vm0 }
 0x507   :  { %v1364_v18 = vsel %vm1361_vm14, %v1363_v62, %v1359_v6  ;;  %v1374_v42 = vsel %vm1373_vm13, %v2137_v51, %v1370_v28  ;;  %v1388_v30 = vsub.f32 1.0, %v1387_v36 }
 0x508   :  { %v1379_v39 = vsel %vm1376_vm15, %v1378_v40, %v1374_v42  ;;  %v1402_v12 = vmul.f32 %v2141_v24, %v1364_v18 }
 0x509   :  { %v1401_v63 = vmul.f32 %v1379_v39, %v3074_v27  ;;  %v1389_v17 = vmul.f32 %v2139_v23, %v1388_v30  ;;  %v2028_v27 = vld [vmem:[%s3124_s4 + $0x38] sm:$0xff] }
 0x50a   :  { %1595 = vmatpush.bf16.msrb.mxu0 %v2028_v27 }
 0x50b   :  { %v3082_v46 = vadd.f32 %v1402_v12, %v1401_v63  ;;  %v1390_v29 = vadd.f32 %v2139_v23, %v1389_v17 }
 0x50d   :  { %2142 = vtanh.f32 %v3082_v46  ;;  %v1394_v5 = vsel %vm1393_vm2, %v2139_v23, %v1390_v29 }
 0x50e   :  { %v1399_v58 = vsel %vm1396_vm3, %v1398_v55, %v1394_v5  ;;  %1596 = vmatpush.bf16.msrb.mxu0 %v2027_v16 }
 0x512   :  { %1597 = vmatpush.bf16.msrb.mxu0 %v2026_v19 }
 0x513   :  { %v2143_v25 = vpop.eup %2142 }
 0x514   :  { %v1405_v57 = vmul.f32 %v2143_v25, %v1399_v58 }
 0x516   :  { %v1406_v0 = vpack.c.bf16 %v1405_v57, %v1405_v57  ;;  %1598 = vmatpush.bf16.msrb.mxu0 %v2025_v38 }
 0x518   :  { %1415 = vmatmul.bf16.vlgmr.msra.gmra.mxu0 %v1406_v0  ;;  %1428 = vmatmul.bf16.vlgmr.msra.gmra.mxu1 %v1406_v0 }
 0x519   :  { %1441 = vmatmul.bf16.vlgmr.msra.gmra.mxu2 %v1406_v0  ;;  %1454 = vmatmul.bf16.vlgmr.msra.gmra.mxu3 %v1406_v0 }
 0x51a   :  { %1599 = vmatpush.bf16.msrb.mxu0 %v2024_v37 }
 0x51e   :  { %1600 = vmatpush.bf16.msrb.mxu0 %v2023_v1 }
 0x522   :  { %1601 = vmatpush.bf16.msrb.mxu0 %v2022_v7 }
 0x526   :  { %1602 = vmatpush.bf16.msrb.mxu0 %v2021_v26 }
 0x595   :  { %v1416_v41 = vpop.f32.mrf.mxu0  ;;  %v1429_v47 = vpop.f32.mrf.mxu1 }
 0x596   :  { %v1459_v49 = vadd.f32 %v1416_v41, %v3167_v48  ;;  %v1460_v59 = vadd.f32 %v1429_v47, %v3168_v53 }
 0x598   :  { %v1918_v60 = vmul.f32 -1.442695, %v1459_v49  ;;  %v1919_v61 = vmul.f32 -1.442695, %v1460_v59 }
 0x59a   :  { %2144 = vpow2.f32 %v1918_v60 }
 0x59b   :  { %2146 = vpow2.f32 %v1919_v61 }
 0x59c   :  { %v1442_v8 = vpop.f32.mrf.mxu2  ;;  %v1455_v9 = vpop.f32.mrf.mxu3 }
 0x59d   :  { %v1462_v20 = vadd.f32 %v1455_v9, %v3169_v13  ;;  %v1418_v21 = vpop.f32.mrf.mxu0  ;;  %v1431_v22 = vpop.f32.mrf.mxu1  ;;  %v1461_v10 = vadd.f32 %v1442_v8, %v3170_v4 }
 0x59f   :  { %v1920_v32 = vmul.f32 -1.442695, %v1462_v20 }
 0x5a0   :  { %v2145_v33 = vpop.eup %2144 }
 0x5a1   :  { %v2147_v34 = vpop.eup %2146  ;;  %v1469_v35 = vadd.f32 1.0, %v2145_v33  ;;  %2148 = vpow2.f32 %v1920_v32 }
 0x5a2   :  { %v1470_v43 = vadd.f32 1.0, %v2147_v34 }
 0x5a3   :  { %2150 = vrcp.f32 %v1469_v35  ;;  %v1482_v23 = vand.u32 2147483648, %v1469_v35  ;;  %v1480_v28 = vand.u32 2147483647, %v1469_v35  ;;  %vm1476_vm6 = vweird.f32 %v1469_v35 }
 0x5a4   :  { %2152 = vrcp.f32 %v1470_v43  ;;  %v1444_v44 = vpop.f32.mrf.mxu2  ;;  %v1457_v51 = vpop.f32.mrf.mxu3  ;;  %v1497_v45 = vand.u32 2147483648, %v1470_v43  ;;  %v1495_v40 = vand.u32 2147483647, %v1470_v43  ;;  %vm1491_vm7 = vweird.f32 %v1470_v43 }
 0x5a5   :  { %v1483_v18 = vor.u32 1.1754944e-38, %v1482_v23  ;;  %vm1481_vm10 = vcmp.eq.f32.partialorder %v1480_v28, 8.507059e+37 }
 0x5a6   :  { %v1498_v39 = vor.u32 1.1754944e-38, %v1497_v45  ;;  %vm1496_vm11 = vcmp.eq.f32.partialorder %v1495_v40, 8.507059e+37 }
 0x5a7   :  { %v2149_v52 = vpop.eup %2148 }
 0x5a8   :  { %v1505_v2 = vadd.f32 1.0, %v2149_v52 }
 0x5a9   :  { %v2151_v3 = vpop.eup %2150 }
 0x5aa   :  { %v2153_v14 = vpop.eup %2152  ;;  %v1472_v15 = vmul.f32 %v2151_v3, %v1469_v35  ;;  %2154 = vrcp.f32 %v1505_v2  ;;  %vm1477_vm4 = vweird.f32 %v2151_v3  ;;  %v1517_v0 = vand.u32 2147483648, %v1505_v2 }
 0x5ab   :  { %v1487_v11 = vmul.f32 %v2153_v14, %v1470_v43  ;;  %2156 = vtanh.f32 %v1461_v10  ;;  %vm1492_vm5 = vweird.f32 %v2153_v14  ;;  %vm1478_vm8 = vmor %vm1476_vm6, %vm1477_vm4  ;;  %vm1511_vm13 = vweird.f32 %v1505_v2 }
 0x5ac   :  { %v1473_v54 = vsub.f32 1.0, %v1472_v15  ;;  %vm1493_vm9 = vmor %vm1491_vm7, %vm1492_vm5  ;;  %v1515_v27 = vand.u32 2147483647, %v1505_v2  ;;  %v1518_v19 = vor.u32 1.1754944e-38, %v1517_v0 }
 0x5ad   :  { %v1488_v31 = vsub.f32 1.0, %v1487_v11 }
 0x5ae   :  { %v1474_v62 = vmul.f32 %v2151_v3, %v1473_v54  ;;  %vm1516_vm15 = vcmp.eq.f32.partialorder %v1515_v27, 8.507059e+37 }
 0x5af   :  { %v1489_v36 = vmul.f32 %v2153_v14, %v1488_v31 }
 0x5b0   :  { %v2155_v6 = vpop.eup %2154  ;;  %v1475_v24 = vadd.f32 %v2151_v3, %v1474_v62 }
 0x5b1   :  { %v1490_v42 = vadd.f32 %v2153_v14, %v1489_v36  ;;  %v1507_v30 = vmul.f32 %v2155_v6, %v1505_v2  ;;  %v2157_v63 = vpop.eup %2156  ;;  %vm1512_vm12 = vweird.f32 %v2155_v6 }
 0x5b2   :  { %v1479_v12 = vsel %vm1478_vm8, %v2151_v3, %v1475_v24  ;;  %vm1513_vm14 = vmor %vm1511_vm13, %vm1512_vm12 }
 0x5b3   :  { %v1484_v17 = vsel %vm1481_vm10, %v1483_v18, %v1479_v12  ;;  %v1494_v29 = vsel %vm1493_vm9, %v2153_v14, %v1490_v42  ;;  %v1508_v50 = vsub.f32 1.0, %v1507_v30 }
 0x5b4   :  { %v1499_v56 = vsel %vm1496_vm11, %v1498_v39, %v1494_v29  ;;  %v1522_v5 = vmul.f32 %v2157_v63, %v1484_v17 }
 0x5b5   :  { %v1521_v55 = vmul.f32 %v1499_v56, %v3082_v46  ;;  %v1509_v25 = vmul.f32 %v2155_v6, %v1508_v50  ;;  %v2031_v46 = vld [vmem:[%s3125_s5] ss:$0 sm:$0xff] }
 0x5b7   :  { %v1523_v58 = vadd.f32 %v1522_v5, %v1521_v55  ;;  %v1510_v57 = vadd.f32 %v2155_v6, %v1509_v25 }
 0x5b9   :  { %2158 = vtanh.f32 %v1523_v58  ;;  %v1514_v16 = vsel %vm1513_vm14, %v2155_v6, %v1510_v57 }
 0x5ba   :  { %v1519_v37 = vsel %vm1516_vm15, %v1518_v19, %v1514_v16 }
 0x5bf   :  { %v2159_v38 = vpop.eup %2158 }
 0x5c0   :  { %v1525_v41 = vmul.f32 %v2159_v38, %v1519_v37 }
 0x5c2   :  { %v1526_v47 = vpack.c.bf16 %v1525_v41, %v1525_v41 }
 0x5c4   :  { %1603 = vmatmul.bf16.vlgmr.msrb.gmra.mxu0 %v1526_v47 }
 0x641   :  { %v1604_v48 = vpop.f32.mrf.mxu0 }
 0x642   :  { %v1605_v49 = vadd.f32 %v2031_v46, %v1604_v48 }
 0x644   :  { %1608 = vst [vmem:[#allocation2] sm:$0xff] %v1605_v49 }
 0x645   :  { %1619 = dma.vmem_to_hbm [thread:$0]  %s1615_s8, 128, %s1617_s11, [#allocation3]  }
 0x649   :  { %v1606_v53 = vpop.f32.mrf.mxu0 }
 0x64a   :  { %2184 = dma.done.wait [#allocation3], 128  }
 0x64b   :  { %2185 = vsyncadd [#allocation3], 4294967168 }
 0x64c   :  { %1624 = vsyncpa [#allocation3], 1 }

</bundles_post_ra>
